<compile_context>
chip_gen: v5e
topology: v5e:2x2
jax: 0.10.0
libtpu: 0.0.40
codegen_flags: <defaults>
</compile_context>

<pallas_src>
import functools

import jax
import jax.numpy as jnp
from jax.experimental import pallas as pl
from jax.experimental.pallas import tpu as pltpu

# Hyper-parameters consistent with the module defaults.
PRE_CH = 4
F_CH = 24
OFF_CH = 3
OUT_CH = 16
MAIN = 64
K = 6
DIST_RANGE = 5.0
BATCH = 80          # demo batch (ragged vs block_rows=32 -> exercises edge block)


def _leaky(x):
    # nn.LeakyReLU default negative_slope = 0.01
    return jnp.where(x >= 0, x, 0.01 * x)


def _finetuner_kernel(x_ref, w_cat_ref, b_in_ref,
                      w_t1_ref, b_t1_ref, w_t2_ref, b_t2_ref,
                      w_o1_ref, b_o1_ref, w_o2_ref,
                      out_ref, *, f_ch, dist_range):
    # x_ref: [K, rows, f_ch+3] neighbor-major; weights are whole VMEM-resident
    # tensors (constant index maps).
    k, rows, c2 = x_ref.shape
    main = b_in_ref.shape[-1]

    # Flatten neighbors onto the row axis (rows % 8 == 0 -> layout no-op) and
    # keep all elementwise math in f32 (v5e has no bf16 VPU/EUP).
    xf = x_ref[...].reshape(k * rows, c2).astype(jnp.float32)

    # Fused [feature | d_weight(offset)] operand via a lane mask: lanes < f_ch
    # pass through, offset lanes get clip(1 - off/5, min=0). No concatenation.
    lane = jax.lax.broadcasted_iota(jnp.int32, xf.shape, 1)
    op = jnp.where(lane < f_ch, xf, jnp.maximum(1.0 - xf / dist_range, 0.0))

    # Single MXU pass for all K neighbors: [k*rows, 27] @ [27, 2*main].
    # Lanes [:main]  = mlp_in pre-bias, lanes [main:] = offset linear
    # (block-diagonal weight built once in the wrapper).
    h = jnp.dot(op, w_cat_ref[...], preferred_element_type=jnp.float32)
    tmp_in = _leaky(h[:, :main] + b_in_ref[...])        # [k*rows, main]
    off_w = jnp.tanh(h[:, main:])                        # [k*rows, main]
    p = tmp_in * off_w

    # Max over the K neighbors: neighbor-major slabs -> aligned sublane slices,
    # K-1 full-vreg maximum ops.
    m = p[:rows]
    for j in range(1, k):
        m = jnp.maximum(m, p[j * rows:(j + 1) * rows])
    tmp_in0 = tmp_in[:rows]                              # neighbor 0 (residual)

    # mlp_tune, residual, mlp_out.
    t = _leaky(jnp.dot(m, w_t1_ref[...], preferred_element_type=jnp.float32)
               + b_t1_ref[...])
    t = _leaky(jnp.dot(t, w_t2_ref[...], preferred_element_type=jnp.float32)
               + b_t2_ref[...])
    t = t + tmp_in0
    o = _leaky(jnp.dot(t, w_o1_ref[...], preferred_element_type=jnp.float32)
               + b_o1_ref[...])
    # OUT_CH=16 -> masked store; output bytes are tiny relative to input so the
    # partial vst is accepted (per review).
    out_ref[...] = jnp.dot(o, w_o2_ref[...], preferred_element_type=jnp.float32)


def _tpu_vmem_capacity_bytes():
    try:
        info = pltpu.get_tpu_info()
        return int(getattr(info, "vmem_capacity_bytes", 128 * 1024 * 1024))
    except Exception:
        return 64 * 1024 * 1024


def _pick_block_rows(n_rows):
    """Row tile sized for the per-core VMEM budget (v7x = 64 MiB)."""
    cap = _tpu_vmem_capacity_bytes()
    block = 2048 if cap >= (96 << 20) else 1024
    n8 = max(8, ((n_rows + 7) // 8) * 8)
    return min(block, n8)


def _vmem_limit_bytes(block_rows, k, c2, out_ch, main, x_itemsize):
    def lanes(v):
        return ((v + 127) // 128) * 128
    rows = ((block_rows + 7) // 8) * 8
    x_blk = k * rows * lanes(c2) * x_itemsize
    out_blk = rows * lanes(out_ch) * 4
    # Generous estimate of live f32 intermediates within one grid step.
    inter = k * rows * (lanes(c2) + lanes(2 * main) + 3 * lanes(main)) * 4
    inter += 8 * rows * lanes(main) * 4
    limit = 2 * (x_blk + out_blk) + inter + (4 << 20)     # 2x = double buffering
    cap = _tpu_vmem_capacity_bytes()
    return int(min(max(limit, 32 << 20), cap - (8 << 20)))


def v2p_finetuner_forward(x, d, params, *, pre_channels=PRE_CH,
                          f_channels=F_CH, block_rows=None, input_dtype=None):
    """x: [N, K, pre+f+3], d: unused (matches the PyTorch forward) -> [N, out]."""
    del d  # `d` is accepted by the module's forward but never used.
    n, k, c = x.shape
    c2 = f_channels + OFF_CH
    assert c == pre_channels + c2, "channel layout mismatch"
    main = params["w_t1"].shape[0]
    out_ch = params["w_o2"].shape[1]

    # Wrapper-side layout fix: drop the unused `pre` channels, go neighbor-major
    # [K, N, f+3] so each neighbor is a contiguous 2-D slab; optionally stream
    # activations as bf16 (weights/compute stay f32).
    x_t = jnp.transpose(x[:, :, pre_channels:pre_channels + c2], (1, 0, 2))
    if input_dtype is not None:
        x_t = x_t.astype(input_dtype)

    if block_rows is None:
        block_rows = _pick_block_rows(n)
    block_rows = max(8, (block_rows // 8) * 8)
    grid = (pl.cdiv(n, block_rows),)   # no jnp.pad: edge block handled by Pallas

    # Block-diagonal concat of mlp_in / mlp_offset weights -> one [27, 2*main]
    # MXU operand (lanes 0:main = w_in, main:2*main = w_off).
    w_cat = jnp.zeros((c2, 2 * main), jnp.float32)
    w_cat = w_cat.at[:f_channels, :main].set(params["w_in"].astype(jnp.float32))
    w_cat = w_cat.at[f_channels:, main:].set(params["w_off"].astype(jnp.float32))

    kernel = functools.partial(_finetuner_kernel, f_ch=f_channels,
                               dist_range=DIST_RANGE)

    def whole(shape):
        return pl.BlockSpec(shape, lambda i, _n=len(shape): (0,) * _n)

    in_specs = [
        pl.BlockSpec((k, block_rows, c2), lambda i: (0, i, 0)),   # activations
        whole(w_cat.shape),
        whole(params["b_in"].shape),
        whole(params["w_t1"].shape),
        whole(params["b_t1"].shape),
        whole(params["w_t2"].shape),
        whole(params["b_t2"].shape),
        whole(params["w_o1"].shape),
        whole(params["b_o1"].shape),
        whole(params["w_o2"].shape),
    ]
    out_spec = pl.BlockSpec((block_rows, out_ch), lambda i: (i, 0))

    vmem_limit = _vmem_limit_bytes(block_rows, k, c2, out_ch, main,
                                   jnp.dtype(x_t.dtype).itemsize)

    # TODO(synk): confirm on v7x that the batch grid axis shards across both
    # TensorCores; if not, switch to pltpu.CORE_PARALLEL / pl.core_map.
    return pl.pallas_call(
        kernel,
        out_shape=jax.ShapeDtypeStruct((n, out_ch), jnp.float32),
        grid=grid,
        in_specs=in_specs,
        out_specs=out_spec,
        compiler_params=pltpu.CompilerParams(
            dimension_semantics=("parallel",),
            vmem_limit_bytes=vmem_limit,
        ),
    )(x_t, w_cat, params["b_in"],
      params["w_t1"], params["b_t1"], params["w_t2"], params["b_t2"],
      params["w_o1"], params["b_o1"], params["w_o2"])


def init_params(key, *, f_channels=F_CH, out_channels=OUT_CH,
                main_channel=MAIN):
    """PyTorch-Linear-style init. Weights stored transposed as [in, out];
    biases as [1, out]."""
    def linear(key, fan_in, fan_out, bias=True):
        kw, kb = jax.random.split(key)
        bound = 1.0 / float(fan_in) ** 0.5
        w = jax.random.uniform(kw, (fan_in, fan_out), jnp.float32, -bound, bound)
        b = (jax.random.uniform(kb, (1, fan_out), jnp.float32, -bound, bound)
             if bias else None)
        return w, b

    ks = jax.random.split(key, 6)
    w_off, _ = linear(ks[0], 3, main_channel, bias=False)       # mlp_offset
    w_in, b_in = linear(ks[1], f_channels, main_channel)        # mlp_in
    w_t1, b_t1 = linear(ks[2], main_channel, main_channel)      # mlp_tune[0]
    w_t2, b_t2 = linear(ks[3], main_channel, main_channel)      # mlp_tune[2]
    w_o1, b_o1 = linear(ks[4], main_channel, main_channel)      # mlp_out[0]
    w_o2, _ = linear(ks[5], main_channel, out_channels, bias=False)  # mlp_out[2]
    return {"w_off": w_off, "w_in": w_in, "b_in": b_in,
            "w_t1": w_t1, "b_t1": b_t1, "w_t2": w_t2, "b_t2": b_t2,
            "w_o1": w_o1, "b_o1": b_o1, "w_o2": w_o2}


def _reference(x, d, p, *, pre_channels=PRE_CH, f_channels=F_CH):
    """Pure-JAX transcription of V2PFinetuner_v5.forward."""
    del d
    # pre = x[:, :, :pre_channels] is computed in the PyTorch forward but unused.
    feature = x[:, :, pre_channels:pre_channels + f_channels]
    offset = x[:, :, pre_channels + f_channels:]
    offset_w = jnp.maximum(1.0 - offset / DIST_RANGE, 0.0)
    tmp_in = _leaky(feature @ p["w_in"] + p["b_in"])            # [N, K, main]
    offset_w = jnp.tanh(offset_w @ p["w_off"])                  # [N, K, main]
    tmp = jnp.max(tmp_in * offset_w, axis=1)                    # [N, main]
    tmp = _leaky(tmp @ p["w_t1"] + p["b_t1"])
    tmp = _leaky(tmp @ p["w_t2"] + p["b_t2"])
    tmp = tmp + tmp_in[:, 0, :]
    o = _leaky(tmp @ p["w_o1"] + p["b_o1"])
    return o @ p["w_o2"]


if __name__ == "__main__":
    key = jax.random.PRNGKey(0)
    kp, kx, kd = jax.random.split(key, 3)
    params = init_params(kp)

    C = PRE_CH + F_CH + OFF_CH
    x = jax.random.normal(kx, (BATCH, K, C), jnp.float32)
    d = jax.random.normal(kd, (BATCH, K), jnp.float32)   # unused by forward

    # block_rows=32 -> grid of ceil(80/32)=3 steps with a ragged final block
    # (exercises the no-pad edge-block path at small scale).
    out = v2p_finetuner_forward(x, d, params, block_rows=32)
    out = jax.block_until_ready(out)

    ref = _reference(x, d, params)
    assert out.shape == (BATCH, OUT_CH)
    max_err = float(jnp.max(jnp.abs(out - ref)))
    assert jnp.allclose(out, ref, atol=5e-4, rtol=5e-4), \
        f"f32 mismatch vs reference (max abs err {max_err})"

    # Optional bf16 activation streaming (halves input HBM bytes); compare
    # against the reference evaluated on the same bf16-quantized inputs.
    out_bf16 = v2p_finetuner_forward(x, d, params, block_rows=32,
                                     input_dtype=jnp.bfloat16)
    out_bf16 = jax.block_until_ready(out_bf16)
    ref_bf16 = _reference(x.astype(jnp.bfloat16).astype(jnp.float32), d, params)
    max_err_b = float(jnp.max(jnp.abs(out_bf16 - ref_bf16)))
    assert jnp.allclose(out_bf16, ref_bf16, atol=2e-3, rtol=2e-3), \
        f"bf16-input mismatch vs quantized reference (max abs err {max_err_b})"

    # TODO(synk): init(), offset_weight()/d_weight() helpers beyond forward, and
    # the unused `pre` slice / `d` argument are not part of the kernel.
    print("KERNEL_OK")
</pallas_src>

<mosaic_0001>
module attributes {stable_mosaic.version = 11 : i64} {
  func.func @_finetuner_kernel(%arg0: i32, %arg1: memref<6x32x27xf32, #tpu.memory_space<vmem>>, %arg2: memref<27x128xf32, #tpu.memory_space<vmem>>, %arg3: memref<1x64xf32, #tpu.memory_space<vmem>>, %arg4: memref<64x64xf32, #tpu.memory_space<vmem>>, %arg5: memref<1x64xf32, #tpu.memory_space<vmem>>, %arg6: memref<64x64xf32, #tpu.memory_space<vmem>>, %arg7: memref<1x64xf32, #tpu.memory_space<vmem>>, %arg8: memref<64x64xf32, #tpu.memory_space<vmem>>, %arg9: memref<1x64xf32, #tpu.memory_space<vmem>>, %arg10: memref<64x16xf32, #tpu.memory_space<vmem>>, %arg11: memref<32x16xf32, #tpu.memory_space<vmem>>) attributes {dimension_semantics = [#tpu.dimension_semantics<parallel>], iteration_bounds = array<i64: 3>, scalar_prefetch = 0 : i64, scratch_operands = 0 : i64, tpu.core_type = #tpu.core_type<tc>, window_params = [{transform_indices = @transform_0, window_bounds = array<i64: 6, 32, 27>}, {pipeline_mode = #tpu.pipeline_mode<synchronous>, transform_indices = @transform_1, window_bounds = array<i64: 27, 128>}, {pipeline_mode = #tpu.pipeline_mode<synchronous>, transform_indices = @transform_2, window_bounds = array<i64: 1, 64>}, {pipeline_mode = #tpu.pipeline_mode<synchronous>, transform_indices = @transform_3, window_bounds = array<i64: 64, 64>}, {pipeline_mode = #tpu.pipeline_mode<synchronous>, transform_indices = @transform_4, window_bounds = array<i64: 1, 64>}, {pipeline_mode = #tpu.pipeline_mode<synchronous>, transform_indices = @transform_5, window_bounds = array<i64: 64, 64>}, {pipeline_mode = #tpu.pipeline_mode<synchronous>, transform_indices = @transform_6, window_bounds = array<i64: 1, 64>}, {pipeline_mode = #tpu.pipeline_mode<synchronous>, transform_indices = @transform_7, window_bounds = array<i64: 64, 64>}, {pipeline_mode = #tpu.pipeline_mode<synchronous>, transform_indices = @transform_8, window_bounds = array<i64: 1, 64>}, {pipeline_mode = #tpu.pipeline_mode<synchronous>, transform_indices = @transform_9, window_bounds = array<i64: 64, 16>}, {transform_indices = @transform_10, window_bounds = array<i64: 32, 16>}]} {
    %c0 = arith.constant 0 : index
    %c0_0 = arith.constant 0 : index
    %c0_1 = arith.constant 0 : index
    %0 = vector.load %arg1[%c0, %c0_0, %c0_1] : memref<6x32x27xf32, #tpu.memory_space<vmem>>, vector<6x32x27xf32>
    %1 = vector.shape_cast %0 : vector<6x32x27xf32> to vector<192x27xf32>
    %2 = tpu.iota {dimensions = array<i32: 1>} : vector<192x27xi32>
    %c24_i32 = arith.constant 24 : i32
    %3 = vector.broadcast %c24_i32 : i32 to vector<192x27xi32>
    %4 = arith.cmpi slt, %2, %3 : vector<192x27xi32>
    %cst = arith.constant 5.000000e+00 : f32
    %5 = vector.broadcast %cst : f32 to vector<192x27xf32>
    %6 = arith.divf %1, %5 : vector<192x27xf32>
    %cst_2 = arith.constant 1.000000e+00 : f32
    %7 = vector.broadcast %cst_2 : f32 to vector<192x27xf32>
    %8 = arith.subf %7, %6 : vector<192x27xf32>
    %cst_3 = arith.constant 0.000000e+00 : f32
    %9 = vector.broadcast %cst_3 : f32 to vector<192x27xf32>
    %10 = arith.maximumf %8, %9 : vector<192x27xf32>
    %11 = arith.select %4, %1, %10 : vector<192x27xi1>, vector<192x27xf32>
    %c0_4 = arith.constant 0 : index
    %c0_5 = arith.constant 0 : index
    %12 = vector.load %arg2[%c0_4, %c0_5] : memref<27x128xf32, #tpu.memory_space<vmem>>, vector<27x128xf32>
    %cst_6 = arith.constant dense<0.000000e+00> : vector<192x128xf32>
    %13 = tpu.matmul %11, %12, %cst_6 {dimension_numbers = #tpu.dot_dimension_numbers<[1], [0], [0], [1], [0, 0, 1, 1], [], []>} : vector<192x27xf32>, vector<27x128xf32>, vector<192x128xf32> -> vector<192x128xf32>
    %14 = vector.extract_strided_slice %13 {offsets = [0, 0], sizes = [192, 64], strides = [1, 1]} : vector<192x128xf32> to vector<192x64xf32>
    %c0_7 = arith.constant 0 : index
    %c0_8 = arith.constant 0 : index
    %15 = vector.load %arg3[%c0_7, %c0_8] : memref<1x64xf32, #tpu.memory_space<vmem>>, vector<1x64xf32>
    %16 = vector.broadcast %15 : vector<1x64xf32> to vector<192x64xf32>
    %17 = arith.addf %14, %16 : vector<192x64xf32>
    %cst_9 = arith.constant 0.000000e+00 : f32
    %18 = vector.broadcast %cst_9 : f32 to vector<192x64xf32>
    %19 = arith.cmpf oge, %17, %18 : vector<192x64xf32>
    %cst_10 = arith.constant 0.00999999977 : f32
    %20 = vector.broadcast %cst_10 : f32 to vector<192x64xf32>
    %21 = arith.mulf %20, %17 : vector<192x64xf32>
    %22 = arith.select %19, %17, %21 : vector<192x64xi1>, vector<192x64xf32>
    %23 = vector.extract_strided_slice %13 {offsets = [0, 64], sizes = [192, 64], strides = [1, 1]} : vector<192x128xf32> to vector<192x64xf32>
    %24 = math.tanh %23 : vector<192x64xf32>
    %25 = arith.mulf %22, %24 : vector<192x64xf32>
    %26 = vector.extract_strided_slice %25 {offsets = [0, 0], sizes = [32, 64], strides = [1, 1]} : vector<192x64xf32> to vector<32x64xf32>
    %27 = vector.extract_strided_slice %25 {offsets = [32, 0], sizes = [32, 64], strides = [1, 1]} : vector<192x64xf32> to vector<32x64xf32>
    %28 = arith.maximumf %26, %27 : vector<32x64xf32>
    %29 = vector.extract_strided_slice %25 {offsets = [64, 0], sizes = [32, 64], strides = [1, 1]} : vector<192x64xf32> to vector<32x64xf32>
    %30 = arith.maximumf %28, %29 : vector<32x64xf32>
    %31 = vector.extract_strided_slice %25 {offsets = [96, 0], sizes = [32, 64], strides = [1, 1]} : vector<192x64xf32> to vector<32x64xf32>
    %32 = arith.maximumf %30, %31 : vector<32x64xf32>
    %33 = vector.extract_strided_slice %25 {offsets = [128, 0], sizes = [32, 64], strides = [1, 1]} : vector<192x64xf32> to vector<32x64xf32>
    %34 = arith.maximumf %32, %33 : vector<32x64xf32>
    %35 = vector.extract_strided_slice %25 {offsets = [160, 0], sizes = [32, 64], strides = [1, 1]} : vector<192x64xf32> to vector<32x64xf32>
    %36 = arith.maximumf %34, %35 : vector<32x64xf32>
    %37 = vector.extract_strided_slice %22 {offsets = [0, 0], sizes = [32, 64], strides = [1, 1]} : vector<192x64xf32> to vector<32x64xf32>
    %c0_11 = arith.constant 0 : index
    %c0_12 = arith.constant 0 : index
    %38 = vector.load %arg4[%c0_11, %c0_12] : memref<64x64xf32, #tpu.memory_space<vmem>>, vector<64x64xf32>
    %cst_13 = arith.constant dense<0.000000e+00> : vector<32x64xf32>
    %39 = tpu.matmul %36, %38, %cst_13 {dimension_numbers = #tpu.dot_dimension_numbers<[1], [0], [0], [1], [0, 0, 1, 1], [], []>} : vector<32x64xf32>, vector<64x64xf32>, vector<32x64xf32> -> vector<32x64xf32>
    %c0_14 = arith.constant 0 : index
    %c0_15 = arith.constant 0 : index
    %40 = vector.load %arg5[%c0_14, %c0_15] : memref<1x64xf32, #tpu.memory_space<vmem>>, vector<1x64xf32>
    %41 = vector.broadcast %40 : vector<1x64xf32> to vector<32x64xf32>
    %42 = arith.addf %39, %41 : vector<32x64xf32>
    %cst_16 = arith.constant 0.000000e+00 : f32
    %43 = vector.broadcast %cst_16 : f32 to vector<32x64xf32>
    %44 = arith.cmpf oge, %42, %43 : vector<32x64xf32>
    %cst_17 = arith.constant 0.00999999977 : f32
    %45 = vector.broadcast %cst_17 : f32 to vector<32x64xf32>
    %46 = arith.mulf %45, %42 : vector<32x64xf32>
    %47 = arith.select %44, %42, %46 : vector<32x64xi1>, vector<32x64xf32>
    %c0_18 = arith.constant 0 : index
    %c0_19 = arith.constant 0 : index
    %48 = vector.load %arg6[%c0_18, %c0_19] : memref<64x64xf32, #tpu.memory_space<vmem>>, vector<64x64xf32>
    %cst_20 = arith.constant dense<0.000000e+00> : vector<32x64xf32>
    %49 = tpu.matmul %47, %48, %cst_20 {dimension_numbers = #tpu.dot_dimension_numbers<[1], [0], [0], [1], [0, 0, 1, 1], [], []>} : vector<32x64xf32>, vector<64x64xf32>, vector<32x64xf32> -> vector<32x64xf32>
    %c0_21 = arith.constant 0 : index
    %c0_22 = arith.constant 0 : index
    %50 = vector.load %arg7[%c0_21, %c0_22] : memref<1x64xf32, #tpu.memory_space<vmem>>, vector<1x64xf32>
    %51 = vector.broadcast %50 : vector<1x64xf32> to vector<32x64xf32>
    %52 = arith.addf %49, %51 : vector<32x64xf32>
    %cst_23 = arith.constant 0.000000e+00 : f32
    %53 = vector.broadcast %cst_23 : f32 to vector<32x64xf32>
    %54 = arith.cmpf oge, %52, %53 : vector<32x64xf32>
    %cst_24 = arith.constant 0.00999999977 : f32
    %55 = vector.broadcast %cst_24 : f32 to vector<32x64xf32>
    %56 = arith.mulf %55, %52 : vector<32x64xf32>
    %57 = arith.select %54, %52, %56 : vector<32x64xi1>, vector<32x64xf32>
    %58 = arith.addf %57, %37 : vector<32x64xf32>
    %c0_25 = arith.constant 0 : index
    %c0_26 = arith.constant 0 : index
    %59 = vector.load %arg8[%c0_25, %c0_26] : memref<64x64xf32, #tpu.memory_space<vmem>>, vector<64x64xf32>
    %cst_27 = arith.constant dense<0.000000e+00> : vector<32x64xf32>
    %60 = tpu.matmul %58, %59, %cst_27 {dimension_numbers = #tpu.dot_dimension_numbers<[1], [0], [0], [1], [0, 0, 1, 1], [], []>} : vector<32x64xf32>, vector<64x64xf32>, vector<32x64xf32> -> vector<32x64xf32>
    %c0_28 = arith.constant 0 : index
    %c0_29 = arith.constant 0 : index
    %61 = vector.load %arg9[%c0_28, %c0_29] : memref<1x64xf32, #tpu.memory_space<vmem>>, vector<1x64xf32>
    %62 = vector.broadcast %61 : vector<1x64xf32> to vector<32x64xf32>
    %63 = arith.addf %60, %62 : vector<32x64xf32>
    %cst_30 = arith.constant 0.000000e+00 : f32
    %64 = vector.broadcast %cst_30 : f32 to vector<32x64xf32>
    %65 = arith.cmpf oge, %63, %64 : vector<32x64xf32>
    %cst_31 = arith.constant 0.00999999977 : f32
    %66 = vector.broadcast %cst_31 : f32 to vector<32x64xf32>
    %67 = arith.mulf %66, %63 : vector<32x64xf32>
    %68 = arith.select %65, %63, %67 : vector<32x64xi1>, vector<32x64xf32>
    %c0_32 = arith.constant 0 : index
    %c0_33 = arith.constant 0 : index
    %69 = vector.load %arg10[%c0_32, %c0_33] : memref<64x16xf32, #tpu.memory_space<vmem>>, vector<64x16xf32>
    %cst_34 = arith.constant dense<0.000000e+00> : vector<32x16xf32>
    %70 = tpu.matmul %68, %69, %cst_34 {dimension_numbers = #tpu.dot_dimension_numbers<[1], [0], [0], [1], [0, 0, 1, 1], [], []>} : vector<32x64xf32>, vector<64x16xf32>, vector<32x16xf32> -> vector<32x16xf32>
    %c0_35 = arith.constant 0 : index
    %c0_36 = arith.constant 0 : index
    %71 = vector.load %arg11[%c0_35, %c0_36] : memref<32x16xf32, #tpu.memory_space<vmem>>, vector<32x16xf32>
    tpu.vector_store %arg11[%c0_35, %c0_36], %70 {strides = array<i32>} : memref<32x16xf32, #tpu.memory_space<vmem>>, vector<32x16xf32>,
    return
  }
  func.func @transform_0(%arg0: i32) -> (i32, i32, i32) {
    %c0_i32 = arith.constant 0 : i32
    %c0_i32_0 = arith.constant 0 : i32
    %c0_i32_1 = arith.constant 0 : i32
    return %c0_i32, %arg0, %c0_i32_0 : i32, i32, i32
  }
  func.func @transform_1(%arg0: i32) -> (i32, i32) {
    %c0_i32 = arith.constant 0 : i32
    %c0_i32_0 = arith.constant 0 : i32
    %c0_i32_1 = arith.constant 0 : i32
    return %c0_i32, %c0_i32_0 : i32, i32
  }
  func.func @transform_2(%arg0: i32) -> (i32, i32) {
    %c0_i32 = arith.constant 0 : i32
    %c0_i32_0 = arith.constant 0 : i32
    %c0_i32_1 = arith.constant 0 : i32
    return %c0_i32, %c0_i32_0 : i32, i32
  }
  func.func @transform_3(%arg0: i32) -> (i32, i32) {
    %c0_i32 = arith.constant 0 : i32
    %c0_i32_0 = arith.constant 0 : i32
    %c0_i32_1 = arith.constant 0 : i32
    return %c0_i32, %c0_i32_0 : i32, i32
  }
  func.func @transform_4(%arg0: i32) -> (i32, i32) {
    %c0_i32 = arith.constant 0 : i32
    %c0_i32_0 = arith.constant 0 : i32
    %c0_i32_1 = arith.constant 0 : i32
    return %c0_i32, %c0_i32_0 : i32, i32
  }
  func.func @transform_5(%arg0: i32) -> (i32, i32) {
    %c0_i32 = arith.constant 0 : i32
    %c0_i32_0 = arith.constant 0 : i32
    %c0_i32_1 = arith.constant 0 : i32
    return %c0_i32, %c0_i32_0 : i32, i32
  }
  func.func @transform_6(%arg0: i32) -> (i32, i32) {
    %c0_i32 = arith.constant 0 : i32
    %c0_i32_0 = arith.constant 0 : i32
    %c0_i32_1 = arith.constant 0 : i32
    return %c0_i32, %c0_i32_0 : i32, i32
  }
  func.func @transform_7(%arg0: i32) -> (i32, i32) {
    %c0_i32 = arith.constant 0 : i32
    %c0_i32_0 = arith.constant 0 : i32
    %c0_i32_1 = arith.constant 0 : i32
    return %c0_i32, %c0_i32_0 : i32, i32
  }
  func.func @transform_8(%arg0: i32) -> (i32, i32) {
    %c0_i32 = arith.constant 0 : i32
    %c0_i32_0 = arith.constant 0 : i32
    %c0_i32_1 = arith.constant 0 : i32
    return %c0_i32, %c0_i32_0 : i32, i32
  }
  func.func @transform_9(%arg0: i32) -> (i32, i32) {
    %c0_i32 = arith.constant 0 : i32
    %c0_i32_0 = arith.constant 0 : i32
    %c0_i32_1 = arith.constant 0 : i32
    return %c0_i32, %c0_i32_0 : i32, i32
  }
  func.func @transform_10(%arg0: i32) -> (i32, i32) {
    %c0_i32 = arith.constant 0 : i32
    %c0_i32_0 = arith.constant 0 : i32
    return %arg0, %c0_i32 : i32, i32
  }
}

</mosaic_0001>

<bundles_post_ra>
// kernel: tpu_custom_call.1
= control target key start
LH: loop header
LB: loop body
LE: loop exit
PB: predicated region body
PF: predicated region fallthrough
CT: control target
= control target key end

     0   :  { %s2913_s0 = inlined_call_operand.vmem [shape: f32[6,80,27], index: 0, kind: input, shape index: {}]   ;;  %s2914_s1 = inlined_call_operand.vmem [shape: f32[27,128], index: 1, kind: input, shape index: {}]   ;;  %s2915_s2 = inlined_call_operand.vmem [shape: f32[1,64], index: 2, kind: input, shape index: {}]   ;;  %s2916_s3 = inlined_call_operand.vmem [shape: f32[64,64], index: 3, kind: input, shape index: {}]   ;;  %s2917_s4 = inlined_call_operand.vmem [shape: f32[1,64], index: 4, kind: input, shape index: {}]   ;;  %s2918_s5 = inlined_call_operand.vmem [shape: f32[64,64], index: 5, kind: input, shape index: {}]   ;;  %s2919_s6 = inlined_call_operand.vmem [shape: f32[1,64], index: 6, kind: input, shape index: {}]   ;;  %s2920_s7 = inlined_call_operand.vmem [shape: f32[64,64], index: 7, kind: input, shape index: {}]   ;;  %s2921_s8 = inlined_call_operand.vmem [shape: f32[1,64], index: 8, kind: input, shape index: {}]   ;;  %s2922_s9 = inlined_call_operand.vmem [shape: f32[64,16], index: 9, kind: input, shape index: {}]   ;;  %s2923_s10 = inlined_call_operand.vmem [shape: f32[80,16], index: 10, kind: output, shape index: {}]  }
   0x1   :  { %2924 = sst [smem:[#allocation5_spill]] %s2913_s0 }
   0x2   :  { %s2195_s13 = smov 0   ;;  %s2197_s14 = smov 0  }
   0x3   :  { %s2199_s15 = smov 0  }
   0x4 LB: > { %s2211_s16 = sadd.s32 4294967295, %s2072_s15   ;;  %s2214_s17 = sadd.s32 1, %s2072_s15   ;;  %s2072_s15 = sphi %s2199_s15, %s2942_s15   ;;  %s2068_s14 = sphi %s2197_s14, %s2941_s14   ;;  %s2064_s13 = sphi %s2195_s13, %s2940_s13  }
   0x5   : > { %s24_s18 = ssub.s32 %s2072_s15, %s2214_s17  ;;  %s27_s19 = sadd.s32 1, %s2068_s14 }
   0x6   : > { %p25_p0 = scmp.eq.s32.totalorder %s24_s18, 0  ;;  %p34_p1 = scmp.ne.s32.totalorder %s2068_s14, %s2064_s13 }
   0x7   : > { %p35_p2 = scmp.eq.s32.totalorder %s2072_s15, 0  ;;  %p253_p3 = scmp.eq.s32.totalorder %s2211_s16, 2 }
   0x8   : > { %s2224_s20 = scalar_select %p25_p0, %s2068_s14, %s27_s19  }
   0x9   : > { %p36_p4 = por %p35_p2, %p34_p1  ;;  %p2226_p5 = por %p253_p3, %p34_p1 }
   0xa   : > { %2925 = sst [smem:[#allocation4_spill]] %s2224_s20  ;;  %p1688_p6 = scmp.ge.s32.totalorder %s2072_s15, 3 }
   0xc   : > { %302 = sbr.rel (%p1688_p6) target bundleno = 79 (0x4f), region = 52 }
  0x11   : > { %305 = sbr.rel (!%p36_p4) target bundleno = 79 (0x4f), region = 56  ;;  %s307_s22 = sand.u32 (%p36_p4), 1, %s2068_s14  }
  0x12   : > { %s1689_s23 = sshll.u32 (%p36_p4), %s2072_s15, 2  ;;  %s1776_s24 = smul.u32 (%p36_p4), 192, %s307_s22 }
  0x13   : > { %s311_s25 = ssub.s32 (%p36_p4), 10, %s1689_s23  ;;  %s1762_s26 = sshll.u32 (%p36_p4), %s2072_s15, 5 }
  0x14   : > { %p312_p7 = scmp.lt.s32.totalorder (%p36_p4), %s311_s25, 4  ;;  %s2927_s0 = sld [smem:[#allocation5_spill]] (%p36_p4) }
  0x15   : > { %s2242_s11 = scalar_lea.vmem (%p36_p4), [#allocation2], %s1776_s24  }
  0x16   : > { %s2944_s25 = smov (!%p312_p7, %s311_s25), 4 }
  0x17   : > { %s314_s30 = smul.u32 48, %s2944_s25 }
  0x19   : > { %p1692_p8 = scmp.eq.s32.totalorder %s314_s30, 0 }
  0x1a   : > { %s2237_s29 = scalar_lea.vmem %s2927_s0, %s1762_s26   ;;  %s2245_s12 = sshrl.u32 (!%p1692_p8), %s2944_s25, 2 }
  0x1b   : > { %320 = sbr.rel (%p1692_p8) target bundleno = 79 (0x4f), region = 60  ;;  %p1693_p9 = scmp.le.s32.totalorder (!%p1692_p8), %s2245_s12, 0 }
  0x20   : > { %1614 = sbr.rel (%p1693_p9) target bundleno = 62 (0x3e), region = 209  ;;  %s2928_s18 = smov (!%p1693_p9), %s2242_s11 }
  0x21   : > { %s2929_s19 = smov (!%p1693_p9), %s2237_s29  ;;  %s2254_s22 = smov (!%p1693_p9), 0  }
  0x22   : > { %s2256_s23 = smov (!%p1693_p9), 0  }
  0x25 LB: >> { %v439_v0 = vld [vmem:[%s2080_s19] sm:$0xff]  ;;  %v441_v1 = vld [vmem:[%s2080_s19 + $0x8] sm:$0xff]  ;;  %v443_v2 = vld [vmem:[%s2080_s19 + $0x10] sm:$0xff]  ;;  %s487_s24 = sadd.s32 1, %s2084_s22  ;;  %s433_s23 = sadd.s32 1, %s2088_s23   ;;  %s2088_s23 = sphi %s2256_s23, %s433_s23   ;;  %s2084_s22 = sphi %s2254_s22, %s2932_s22   ;;  %s2080_s19 = sphi %s2929_s19, %s2931_s19   ;;  %s2076_s18 = sphi %s2928_s18, %s2930_s18  }
  0x26   : >> { %440 = vst [vmem:[%s2076_s18] sm:$0xff] %v439_v0  ;;  %v445_v3 = vld [vmem:[%s2080_s19 + $0x18] sm:$0xff]  ;;  %p488_p10 = scmp.ge.s32.totalorder %s487_s24, %s2245_s12  ;;  %v447_v4 = vld [vmem:[%s2080_s19 + $0x50] sm:$0xff]  ;;  %v451_v6 = vld [vmem:[%s2080_s19 + $0x60] sm:$0xff]  ;;  %p432_p11 = scmp.ge.s32.totalorder %s433_s23, %s2245_s12 }
  0x27   : >> { %442 = vst [vmem:[%s2076_s18 + $0x8] sm:$0xff] %v441_v1  ;;  %v449_v5 = vld [vmem:[%s2080_s19 + $0x58] sm:$0xff]  ;;  %v453_v7 = vld [vmem:[%s2080_s19 + $0x68] sm:$0xff]  ;;  %v455_v8 = vld [vmem:[%s2080_s19 + $0xa0] sm:$0xff] }
  0x28   : >> { %444 = vst [vmem:[%s2076_s18 + $0x10] sm:$0xff] %v443_v2  ;;  %s2946_s24 = smov (%p488_p10, %s487_s24), 0  ;;  %v457_v9 = vld [vmem:[%s2080_s19 + $0xa8] sm:$0xff]  ;;  %v459_v10 = vld [vmem:[%s2080_s19 + $0xb0] sm:$0xff]  ;;  %v461_v11 = vld [vmem:[%s2080_s19 + $0xb8] sm:$0xff] }
  0x29   : >> { %446 = vst [vmem:[%s2076_s18 + $0x18] sm:$0xff] %v445_v3  ;;  %s1694_s26 = sshll.u32 %s2946_s24, 5  ;;  %v463_v12 = vld [vmem:[%s2080_s19 + $0xf0] sm:$0xff]  ;;  %v465_v13 = vld [vmem:[%s2080_s19 + $0xf8] sm:$0xff]  ;;  %v467_v14 = vld [vmem:[%s2080_s19 + $0x100] sm:$0xff]  ;;  %s2932_s22 = smov %s2946_s24 }
  0x2a   : >> { %448 = vst [vmem:[%s2076_s18 + $0x20] sm:$0xff] %v447_v4  ;;  %s2288_s27 = scalar_lea.vmem %s2237_s29, %s1694_s26   ;;  %s2291_s28 = scalar_lea.vmem %s2242_s11, %s1694_s26 [#allocation2]   ;;  %v469_v15 = vld [vmem:[%s2080_s19 + $0x108] sm:$0xff]  ;;  %v471_v16 = vld [vmem:[%s2080_s19 + $0x140] sm:$0xff]  ;;  %v475_v18 = vld [vmem:[%s2080_s19 + $0x150] sm:$0xff] }
  0x2b   : >> { %450 = vst [vmem:[%s2076_s18 + $0x28] sm:$0xff] %v449_v5  ;;  %v473_v17 = vld [vmem:[%s2080_s19 + $0x148] sm:$0xff]  ;;  %v477_v19 = vld [vmem:[%s2080_s19 + $0x158] sm:$0xff]  ;;  %v479_v20 = vld [vmem:[%s2080_s19 + $0x190] sm:$0xff] }
  0x2c   : >> { %452 = vst [vmem:[%s2076_s18 + $0x30] sm:$0xff] %v451_v6  ;;  %v481_v21 = vld [vmem:[%s2080_s19 + $0x198] sm:$0xff]  ;;  %v483_v22 = vld [vmem:[%s2080_s19 + $0x1a0] sm:$0xff]  ;;  %v485_v23 = vld [vmem:[%s2080_s19 + $0x1a8] sm:$0xff]  ;;  %s2931_s19 = smov %s2288_s27 }
  0x2d   : >> { %454 = vst [vmem:[%s2076_s18 + $0x38] sm:$0xff] %v453_v7 }
  0x2e   : >> { %456 = vst [vmem:[%s2076_s18 + $0x40] sm:$0xff] %v455_v8 }
  0x2f   : >> { %458 = vst [vmem:[%s2076_s18 + $0x48] sm:$0xff] %v457_v9 }
  0x30   : >> { %460 = vst [vmem:[%s2076_s18 + $0x50] sm:$0xff] %v459_v10 }
  0x31   : >> { %462 = vst [vmem:[%s2076_s18 + $0x58] sm:$0xff] %v461_v11 }
  0x32   : >> { %464 = vst [vmem:[%s2076_s18 + $0x60] sm:$0xff] %v463_v12 }
  0x33   : >> { %466 = vst [vmem:[%s2076_s18 + $0x68] sm:$0xff] %v465_v13 }
  0x34   : >> { %468 = vst [vmem:[%s2076_s18 + $0x70] sm:$0xff] %v467_v14 }
  0x35   : >> { %470 = vst [vmem:[%s2076_s18 + $0x78] sm:$0xff] %v469_v15 }
  0x36   : >> { %472 = vst [vmem:[%s2076_s18 + $0x80] sm:$0xff] %v471_v16 }
  0x37   : >> { %474 = vst [vmem:[%s2076_s18 + $0x88] sm:$0xff] %v473_v17 }
  0x38   : >> { %476 = vst [vmem:[%s2076_s18 + $0x90] sm:$0xff] %v475_v18 }
  0x39   : >> { %478 = vst [vmem:[%s2076_s18 + $0x98] sm:$0xff] %v477_v19  ;;  %435 = sbr.rel (!%p432_p11) target bundleno = 37 (0x25), region = 215 }
  0x3a   : >> { %480 = vst [vmem:[%s2076_s18 + $0xa0] sm:$0xff] %v479_v20 }
  0x3b   : >> { %482 = vst [vmem:[%s2076_s18 + $0xa8] sm:$0xff] %v481_v21 }
  0x3c   : >> { %484 = vst [vmem:[%s2076_s18 + $0xb0] sm:$0xff] %v483_v22 }
  0x3d   : >> { %486 = vst [vmem:[%s2076_s18 + $0xb8] sm:$0xff] %v485_v23  ;;  %s2930_s18 = smov %s2291_s28 }
  0x3e PF: > { %s2340_s30 = sand.u32 3, %s2944_s25   ;;  %s1763_s26 = sshll.u32 %s2245_s12, 5 }
  0x3f   : > { %s2344_s0 = scalar_lea.vmem %s2237_s29, %s1763_s26   ;;  %s2347_s20 = scalar_lea.vmem %s2242_s11, %s1763_s26 [#allocation2]  }
  0x40   : > { %p1699_p12 = scmp.le.s32.totalorder %s2340_s30, 0 }
  0x41   : > { %s2933_s23 = smov (!%p1699_p12), %s2347_s20  ;;  %s2934_s18 = smov (!%p1699_p12), %s2344_s0 }
  0x42   : > { %1628 = sbr.rel (%p1699_p12) target bundleno = 79 (0x4f), region = 220  ;;  %s2356_s19 = smov (!%p1699_p12), 0  }
  0x43   : > { %s2358_s22 = smov (!%p1699_p12), 0  }
  0x47 LB: >> { %v510_v24 = vld [vmem:[%s2096_s18] sm:$0xff]  ;;  %v512_v25 = vld [vmem:[%s2096_s18 + $0x50] sm:$0xff]  ;;  %s522_s25 = sadd.s32 1, %s2100_s19  ;;  %s504_s22 = sadd.s32 1, %s2104_s22   ;;  %s2104_s22 = sphi %s2358_s22, %s504_s22   ;;  %s2100_s19 = sphi %s2356_s19, %s2935_s19   ;;  %s2096_s18 = sphi %s2934_s18, %s527_s18   ;;  %s2092_s23 = sphi %s2933_s23, %s528_s23  }
  0x48   : >> { %v514_v26 = vld [vmem:[%s2096_s18 + $0xa0] sm:$0xff]  ;;  %511 = vst [vmem:[%s2092_s23] sm:$0xff] %v510_v24  ;;  %v516_v27 = vld [vmem:[%s2096_s18 + $0xf0] sm:$0xff]  ;;  %p523_p13 = scmp.ge.s32.totalorder %s522_s25, %s2340_s30  ;;  %p503_p0 = scmp.ge.s32.totalorder %s504_s22, %s2340_s30 }
  0x49   : >> { %513 = vst [vmem:[%s2092_s23 + $0x20] sm:$0xff] %v512_v25  ;;  %v518_v28 = vld [vmem:[%s2096_s18 + $0x140] sm:$0xff]  ;;  %v520_v29 = vld [vmem:[%s2096_s18 + $0x190] sm:$0xff] }
  0x4a   : >> { %515 = vst [vmem:[%s2092_s23 + $0x40] sm:$0xff] %v514_v26  ;;  %s2948_s25 = smov (%p523_p13, %s522_s25), 0  ;;  %506 = sbr.rel (!%p503_p0) target bundleno = 71 (0x47), region = 226 }
  0x4b   : >> { %517 = vst [vmem:[%s2092_s23 + $0x60] sm:$0xff] %v516_v27  ;;  %s1700_s29 = sshll.u32 %s2948_s25, 3  ;;  %s2935_s19 = smov %s2948_s25 }
  0x4c   : >> { %519 = vst [vmem:[%s2092_s23 + $0x80] sm:$0xff] %v518_v28  ;;  %s527_s18 = scalar_lea.vmem %s2344_s0, %s1700_s29  }
  0x4d   : >> { %521 = vst [vmem:[%s2092_s23 + $0xa0] sm:$0xff] %v520_v29  ;;  %s528_s23 = scalar_lea.vmem %s2347_s20, %s1700_s29 [#allocation2]  }
  0x4f PF: > { %p1702_p1 = scmp.ge.s32.totalorder %s2072_s15, 1  ;;  %p533_p2 = scmp.lt.s32.totalorder %s2072_s15, 4 }
  0x51   : > { %p534_p3 = pnand %p1702_p1, %p533_p2 }
  0x52   : > { %s540_s30 = sand.u32 (!%p534_p3), 1, %s2064_s13   ;;  %s2139_s18 = smov (!%p534_p3), 64  }
  0x53   : > { %537 = sbr.rel (%p534_p3) target bundleno = 1035 (0x40b), region = 108 }
  0x54   : > { %s1777_s26 = smul.u32 (!%p534_p3), 192, %s540_s30 }
  0x56   : > { %s2393_s23 = scalar_lea.vmem (!%p534_p3), [#allocation2], %s1777_s26  ;;  %s1703_s26 = sshll.u32 (!%p534_p3), %s540_s30, 5 }
  0x58   : > { %v719_v30 = vld [vmem:[%s2914_s1 + $0x18] sm:$0x7]  ;;  %vm793_vm0 = vcmask 1042432   ;;  %v718_v31 = vld [vmem:[%s2914_s1 + $0x10] sm:$0xff]  ;;  %v717_v32 = vld [vmem:[%s2914_s1 + $0x8] sm:$0xff]  ;;  %v2138_v33 = vmov 5.0   ;;  %v610_v38 = vlaneseq }
  0x59   : > { %1704 = vmatpush.msk.msra.mxu0 %vm793_vm0, %v719_v30  ;;  %1768 = vmatpush.msk.msra.mxu2 %vm793_vm0, %v719_v30  ;;  %1936 = vrcp.f32 %v2138_v33  ;;  %v716_v34 = vld [vmem:[%s2914_s1] sm:$0xff]  ;;  %v597_v42 = vld [vmem:[%s2393_s23 + $0x58] sm:$0xff]  ;;  %v604_v43 = vld [vmem:[%s2393_s23 + $0x90] sm:$0xff]  ;;  %vm720_vm3 = vcmask 220160   ;;  %s1746_s13 = sshll.u32 (%p2226_p5), %s2211_s16, 2  ;;  %s1765_s30 = sshll.u32 (%p2226_p5), %s2211_s16, 5 }
  0x5a   : > { %1769 = vmatpush.msk.msra.mxu3 %vm793_vm0, %v719_v30  ;;  %v586_v40 = vld [vmem:[%s2393_s23] sm:$0xff]  ;;  %v587_v44 = vld [vmem:[%s2393_s23 + $0x8] sm:$0xff]  ;;  %v605_v46 = vld [vmem:[%s2393_s23 + $0x98] sm:$0xff]  ;;  %v2401_v47 = vand.u32 127, %v610_v38  ;;  %s2864_s25 = scalar_lea.vmem (%p2226_p5), %s2923_s10, %s1765_s30  }
  0x5b   : > { %810 = vmatpush.msra.mxu0 %v718_v31  ;;  %1770 = vmatpush.msra.mxu2 %v718_v31  ;;  %v598_v45 = vld [vmem:[%s2393_s23 + $0x60] sm:$0xff]  ;;  %v588_v0 = vld [vmem:[%s2393_s23 + $0x10] sm:$0xff]  ;;  %v599_v1 = vld [vmem:[%s2393_s23 + $0x68] sm:$0xff] }
  0x5c   : > { %1771 = vmatpush.msra.mxu3 %v718_v31  ;;  %vm612_vm2 = vcmp.lt.s32.totalorder %v2401_v47, 24  ;;  %v606_v5 = vld [vmem:[%s2393_s23 + $0xa0] sm:$0xff]  ;;  %v589_v18 = vld [vmem:[%s2393_s23 + $0x18] sm:$0xff]  ;;  %v600_v19 = vld [vmem:[%s2393_s23 + $0x70] sm:$0xff] }
  0x5d   : > { %811 = vmatpush.msra.mxu0 %v717_v32  ;;  %1772 = vmatpush.msra.mxu2 %v717_v32  ;;  %v590_v30 = vld [vmem:[%s2393_s23 + $0x20] sm:$0xff]  ;;  %v601_v31 = vld [vmem:[%s2393_s23 + $0x78] sm:$0xff] }
  0x5e   : > { %1773 = vmatpush.msra.mxu3 %v717_v32 }
  0x5f   : > { %812 = vmatpush.msra.mxu0 %v716_v34  ;;  %1774 = vmatpush.msra.mxu2 %v716_v34  ;;  %v1937_v35 = vpop.eup %1936 }
  0x60   : > { %1775 = vmatpush.msra.mxu3 %v716_v34  ;;  %v614_v36 = vmul.f32 5.0, %v1937_v35  ;;  %vm618_vm1 = vweird.f32 %v1937_v35 }
  0x62   : > { %v615_v37 = vsub.f32 1.0, %v614_v36 }
  0x64   : > { %v616_v39 = vmul.f32 %v1937_v35, %v615_v37 }
  0x66   : > { %v617_v41 = vadd.f32 %v1937_v35, %v616_v39 }
  0x68   : > { %v2403_v48 = vsel %vm618_vm1, %v1937_v35, %v617_v41  ;;  %v602_v41 = vld [vmem:[%s2393_s23 + $0x80] sm:$0xff] }
  0x69   : > { %v620_v49 = vmul.f32 %v2403_v48, %v586_v40  ;;  %v631_v50 = vmul.f32 %v2403_v48, %v597_v42  ;;  %v638_v51 = vmul.f32 %v2403_v48, %v604_v43  ;;  %v621_v52 = vmul.f32 %v2403_v48, %v587_v44 }
  0x6a   : > { %v632_v53 = vmul.f32 %v2403_v48, %v598_v45  ;;  %v639_v54 = vmul.f32 %v2403_v48, %v605_v46  ;;  %v622_v8 = vmul.f32 %v2403_v48, %v588_v0  ;;  %v633_v9 = vmul.f32 %v2403_v48, %v599_v1 }
  0x6b   : > { %v644_v55 = vsub.f32 1.0, %v620_v49  ;;  %v655_v56 = vsub.f32 1.0, %v631_v50  ;;  %v662_v57 = vsub.f32 1.0, %v638_v51  ;;  %v645_v58 = vsub.f32 1.0, %v621_v52  ;;  %v607_v50 = vld [vmem:[%s2393_s23 + $0xa8] sm:$0xff] }
  0x6c   : > { %v656_v62 = vsub.f32 1.0, %v632_v53  ;;  %v663_v63 = vsub.f32 1.0, %v639_v54  ;;  %v640_v11 = vmul.f32 %v2403_v48, %v606_v5  ;;  %v646_v14 = vsub.f32 1.0, %v622_v8 }
  0x6d   : > { %v668_v59 = vmax.f32 %v644_v55, 0.0  ;;  %v679_v60 = vmax.f32 %v655_v56, 0.0  ;;  %v686_v61 = vmax.f32 %v662_v57, 0.0  ;;  %v669_v6 = vmax.f32 %v645_v58, 0.0 }
  0x6e   : > { %v680_v7 = vmax.f32 %v656_v62, 0.0  ;;  %v687_v10 = vmax.f32 %v663_v63, 0.0  ;;  %v657_v15 = vsub.f32 1.0, %v633_v9  ;;  %v664_v17 = vsub.f32 1.0, %v640_v11 }
  0x6f   : > { %v692_v2 = vsel %vm612_vm2, %v586_v40, %v668_v59  ;;  %v703_v3 = vsel %vm612_vm2, %v597_v42, %v679_v60  ;;  %v710_v4 = vsel %vm612_vm2, %v604_v43, %v686_v61  ;;  %v693_v12 = vsel %vm612_vm2, %v587_v44, %v669_v6  ;;  %v591_v40 = vld [vmem:[%s2393_s23 + $0x28] sm:$0xff]  ;;  %v594_v43 = vld [vmem:[%s2393_s23 + $0x40] sm:$0xff]  ;;  %v592_v59 = vld [vmem:[%s2393_s23 + $0x30] sm:$0xff] }
  0x70   : > { %1705 = vmatmul.msk.f32.vlgmr.msra.gmra.mxu0 %vm720_vm3, %v692_v2  ;;  %1716 = vmatmul.msk.f32.vlgmr.msra.gmra.mxu2 %vm720_vm3, %v703_v3  ;;  %v704_v13 = vsel %vm612_vm2, %v598_v45, %v680_v7  ;;  %v711_v16 = vsel %vm612_vm2, %v605_v46, %v687_v10  ;;  %v670_v20 = vmax.f32 %v646_v14, 0.0  ;;  %v681_v21 = vmax.f32 %v657_v15, 0.0  ;;  %v603_v60 = vld [vmem:[%s2393_s23 + $0x88] sm:$0xff]  ;;  %v596_v14 = vld [vmem:[%s2393_s23 + $0x50] sm:$0xff] }
  0x71   : > { %1723 = vmatmul.msk.f32.vlgmr.msra.gmra.mxu3 %vm720_vm3, %v710_v4  ;;  %v623_v22 = vmul.f32 %v2403_v48, %v589_v18  ;;  %v634_v23 = vmul.f32 %v2403_v48, %v600_v19  ;;  %v688_v24 = vmax.f32 %v664_v17, 0.0  ;;  %v624_v34 = vmul.f32 %v2403_v48, %v590_v30 }
  0x72   : > { %v694_v25 = vsel %vm612_vm2, %v588_v0, %v670_v20  ;;  %v705_v26 = vsel %vm612_vm2, %v599_v1, %v681_v21  ;;  %v635_v35 = vmul.f32 %v2403_v48, %v601_v31  ;;  %v625_v42 = vmul.f32 %v2403_v48, %v591_v40  ;;  %v595_v1 = vld [vmem:[%s2393_s23 + $0x48] sm:$0xff] }
  0x73   : > { %v647_v27 = vsub.f32 1.0, %v623_v22  ;;  %v658_v28 = vsub.f32 1.0, %v634_v23  ;;  %v712_v29 = vsel %vm612_vm2, %v606_v5, %v688_v24  ;;  %v648_v38 = vsub.f32 1.0, %v624_v34 }
  0x74   : > { %v659_v39 = vsub.f32 1.0, %v635_v35  ;;  %v636_v46 = vmul.f32 %v2403_v48, %v602_v41  ;;  %v628_v49 = vmul.f32 %v2403_v48, %v594_v43  ;;  %v641_v51 = vmul.f32 %v2403_v48, %v607_v50 }
  0x75   : > { %v671_v32 = vmax.f32 %v647_v27, 0.0  ;;  %v682_v33 = vmax.f32 %v658_v28, 0.0  ;;  %v672_v44 = vmax.f32 %v648_v38, 0.0  ;;  %v649_v53 = vsub.f32 1.0, %v625_v42 }
  0x76   : > { %v683_v45 = vmax.f32 %v659_v39, 0.0  ;;  %v652_v52 = vsub.f32 1.0, %v628_v49  ;;  %v665_v54 = vsub.f32 1.0, %v641_v51  ;;  %v660_v57 = vsub.f32 1.0, %v636_v46 }
  0x77   : > { %v695_v36 = vsel %vm612_vm2, %v589_v18, %v671_v32  ;;  %v706_v37 = vsel %vm612_vm2, %v600_v19, %v682_v33  ;;  %v696_v55 = vsel %vm612_vm2, %v590_v30, %v672_v44  ;;  %v673_v63 = vmax.f32 %v649_v53, 0.0  ;;  %v608_v19 = vld [vmem:[%s2393_s23 + $0xb0] sm:$0xff]  ;;  %v609_v30 = vld [vmem:[%s2393_s23 + $0xb8] sm:$0xff] }
  0x78   : > { %1706 = vmatmul.msk.f32.gmra.mxu0 %vm720_vm3, %v693_v12  ;;  %1717 = vmatmul.msk.f32.gmra.mxu2 %vm720_vm3, %v704_v13  ;;  %v707_v56 = vsel %vm612_vm2, %v601_v31, %v683_v45  ;;  %v676_v58 = vmax.f32 %v652_v52, 0.0  ;;  %v689_v61 = vmax.f32 %v665_v54, 0.0  ;;  %v684_v2 = vmax.f32 %v660_v57, 0.0  ;;  %v593_v12 = vld [vmem:[%s2393_s23 + $0x38] sm:$0xff]  ;;  %s2851_s23 = scalar_lea.vmem [#allocation3], %s1703_s26  }
  0x79   : > { %1724 = vmatmul.msk.f32.gmra.mxu3 %vm720_vm3, %v711_v16  ;;  %v626_v3 = vmul.f32 %v2403_v48, %v592_v59  ;;  %v637_v4 = vmul.f32 %v2403_v48, %v603_v60  ;;  %v629_v5 = vmul.f32 %v2403_v48, %v595_v1  ;;  %v697_v7 = vsel %vm612_vm2, %v591_v40, %v673_v63 }
  0x7a   : > { %v700_v62 = vsel %vm612_vm2, %v594_v43, %v676_v58  ;;  %v713_v0 = vsel %vm612_vm2, %v607_v50, %v689_v61  ;;  %v708_v8 = vsel %vm612_vm2, %v602_v41, %v684_v2  ;;  %v627_v17 = vmul.f32 %v2403_v48, %v593_v12 }
  0x7b   : > { %v653_v6 = vsub.f32 1.0, %v629_v5  ;;  %v650_v9 = vsub.f32 1.0, %v626_v3  ;;  %v661_v10 = vsub.f32 1.0, %v637_v4  ;;  %v630_v18 = vmul.f32 %v2403_v48, %v596_v14 }
  0x7c   : > { %v642_v20 = vmul.f32 %v2403_v48, %v608_v19  ;;  %v643_v32 = vmul.f32 %v2403_v48, %v609_v30 }
  0x7d   : > { %v677_v11 = vmax.f32 %v653_v6, 0.0  ;;  %v674_v15 = vmax.f32 %v650_v9, 0.0  ;;  %v685_v16 = vmax.f32 %v661_v10, 0.0  ;;  %v654_v21 = vsub.f32 1.0, %v630_v18 }
  0x7e   : > { %v666_v22 = vsub.f32 1.0, %v642_v20  ;;  %v667_v33 = vsub.f32 1.0, %v643_v32  ;;  %v1153_v32 = vld [vmem:[%s2916_s3 + $0x18] sm:$0xff] }
  0x7f   : > { %v701_v13 = vsel %vm612_vm2, %v595_v1, %v677_v11  ;;  %v698_v23 = vsel %vm612_vm2, %v592_v59, %v674_v15  ;;  %v709_v24 = vsel %vm612_vm2, %v603_v60, %v685_v16 }
  0x80   : > { %1707 = vmatmul.msk.f32.gmra.mxu0 %vm720_vm3, %v694_v25  ;;  %1718 = vmatmul.msk.f32.gmra.mxu2 %vm720_vm3, %v705_v26  ;;  %v651_v25 = vsub.f32 1.0, %v627_v17  ;;  %v678_v26 = vmax.f32 %v654_v21, 0.0  ;;  %v690_v27 = vmax.f32 %v666_v22, 0.0  ;;  %v691_v35 = vmax.f32 %v667_v33, 0.0 }
  0x81   : > { %1725 = vmatmul.msk.f32.gmra.mxu3 %vm720_vm3, %v712_v29 }
  0x82   : > { %v702_v28 = vsel %vm612_vm2, %v596_v14, %v678_v26  ;;  %v714_v29 = vsel %vm612_vm2, %v608_v19, %v690_v27  ;;  %v675_v31 = vmax.f32 %v651_v25, 0.0  ;;  %v1157_v25 = vld [vmem:[%s2916_s3 + $0x38] sm:$0xff]  ;;  %v1156_v26 = vld [vmem:[%s2916_s3 + $0x30] sm:$0xff]  ;;  %v1155_v27 = vld [vmem:[%s2916_s3 + $0x28] sm:$0xff] }
  0x83   : > { %1183 = vmatpush.msra.mxu1 %v1157_v25 }
  0x84   : > { %v699_v34 = vsel %vm612_vm2, %v593_v12, %v675_v31  ;;  %v2636_v31 = vld [vmem:[%s2915_s2] ss:$0 sm:$0xff] }
  0x85   : > { %1184 = vmatpush.msra.mxu1 %v1156_v26 }
  0x87   : > { %1185 = vmatpush.msra.mxu1 %v1155_v27 }
  0x88   : > { %1708 = vmatmul.msk.f32.gmra.mxu0 %vm720_vm3, %v695_v36  ;;  %1719 = vmatmul.msk.f32.gmra.mxu2 %vm720_vm3, %v706_v37  ;;  %v715_v36 = vsel %vm612_vm2, %v609_v30, %v691_v35  ;;  %v1154_v30 = vld [vmem:[%s2916_s3 + $0x20] sm:$0xff] }
  0x89   : > { %1726 = vmatmul.msk.f32.gmra.mxu3 %vm720_vm3, %v713_v0  ;;  %1186 = vmatpush.msra.mxu1 %v1154_v30 }
  0x8b   : > { %1187 = vmatpush.msra.mxu1 %v1153_v32 }
  0x90   : > { %1709 = vmatmul.msk.f32.gmra.mxu0 %vm720_vm3, %v696_v55  ;;  %1720 = vmatmul.msk.f32.gmra.mxu2 %vm720_vm3, %v707_v56 }
  0x91   : > { %1727 = vmatmul.msk.f32.gmra.mxu3 %vm720_vm3, %v714_v29 }
  0x98   : > { %1710 = vmatmul.msk.f32.gmra.mxu0 %vm720_vm3, %v697_v7  ;;  %1721 = vmatmul.msk.f32.gmra.mxu2 %vm720_vm3, %v708_v8 }
  0x99   : > { %1728 = vmatmul.msk.f32.gmra.mxu3 %vm720_vm3, %v715_v36  ;;  %v1151_v36 = vld [vmem:[%s2916_s3 + $0x8] sm:$0xff] }
  0xa0   : > { %1711 = vmatmul.msk.f32.gmra.mxu0 %vm720_vm3, %v698_v23  ;;  %1722 = vmatmul.msk.f32.gmra.mxu2 %vm720_vm3, %v709_v24 }
  0xa8   : > { %1712 = vmatmul.msk.f32.gmra.mxu0 %vm720_vm3, %v699_v34  ;;  %v1152_v34 = vld [vmem:[%s2916_s3 + $0x10] sm:$0xff] }
  0xa9   : > { %1188 = vmatpush.msra.mxu1 %v1152_v34 }
  0xab   : > { %1189 = vmatpush.msra.mxu1 %v1151_v36 }
  0xb0   : > { %1713 = vmatmul.msk.f32.gmra.mxu0 %vm720_vm3, %v700_v62 }
  0xb8   : > { %1714 = vmatmul.msk.f32.gmra.mxu0 %vm720_vm3, %v701_v13 }
  0xc0   : > { %1715 = vmatmul.msk.f32.gmra.mxu0 %vm720_vm3, %v702_v28 }
  0xed   : > { %v2520_v37 = vpop.f32.mrf.mxu0 }
  0xee   : > { %1938 = vtanh.f32 %v2520_v37 }
  0xf3   : > { %v2523_v48 = vpop.f32.mrf.mxu2 }
  0xf4   : > { %v1939_v38 = vpop.eup %1938  ;;  %v2525_v39 = vpop.f32.mrf.mxu3 }
  0xf5   : > { %1034 = vrot.lane.b32.xlu0 %v1939_v38, %s2139_s18  ;;  %v2528_v47 = vpop.f32.mrf.mxu0 }
  0xf6   : > { %1940 = vtanh.f32 %v2528_v47  ;;  %v891_v38 = vadd.f32 %v2636_v31, %v2528_v47 }
  0xf8   : > { %v939_v47 = vmul.f32 0.01, %v891_v38  ;;  %vm915_vm5 = vcmp.ge.f32.partialorder %v891_v38, 0.0 }
  0xfb   : > { %v2531_v40 = vpop.f32.mrf.mxu2 }
  0xfc   : > { %v1941_v41 = vpop.eup %1940  ;;  %1942 = vtanh.f32 %v2531_v40  ;;  %v2534_v42 = vpop.f32.mrf.mxu3  ;;  %v902_v25 = vadd.f32 %v2636_v31, %v2531_v40 }
  0xfd   : > { %1036 = vrot.lane.b32.xlu2 %v1941_v41, %s2139_s18  ;;  %v2537_v43 = vpop.f32.mrf.mxu0 }
  0xfe   : > { %1944 = vtanh.f32 %v2537_v43  ;;  %vm926_vm15 = vcmp.ge.f32.partialorder %v902_v25, 0.0 }
 0x102   : > { %v1943_v44 = vpop.eup %1942 }
 0x103   : > { %1058 = vrot.lane.b32.xlu1 %v1943_v44, %s2139_s18  ;;  %v2541_v45 = vpop.f32.mrf.mxu2 }
 0x104   : > { %v1945_v46 = vpop.eup %1944  ;;  %v2543_v49 = vpop.f32.mrf.mxu3  ;;  %1946 = vtanh.f32 %v2541_v45 }
 0x105   : > { %1948 = vtanh.f32 %v2543_v49  ;;  %1038 = vrot.lane.b32.xlu2 %v1945_v46, %s2139_s18  ;;  %v2548_v50 = vpop.f32.mrf.mxu0 }
 0x10a   : > { %v1947_v51 = vpop.eup %1946 }
 0x10b   : > { %v1949_v52 = vpop.eup %1948  ;;  %v2550_v53 = vpop.f32.mrf.mxu2  ;;  %1060 = vrot.lane.b32.xlu0 %v1947_v51, %s2139_s18 }
 0x10c   : > { %1074 = vrot.lane.b32.xlu1 %v1949_v52, %s2139_s18  ;;  %v2586_v6 = vpop.f32.mrf.mxu3  ;;  %v890_v52 = vadd.f32 %v2636_v31, %v2520_v37  ;;  %v892_v37 = vadd.f32 %v2636_v31, %v2537_v43 }
 0x10d   : > { %v2554_v54 = vpop.f32.mrf.mxu0 }
 0x10e   : > { %1950 = vtanh.f32 %v2554_v54  ;;  %vm914_vm7 = vcmp.ge.f32.partialorder %v890_v52, 0.0  ;;  %vm916_vm10 = vcmp.ge.f32.partialorder %v892_v37, 0.0 }
 0x113   : > { %v2557_v55 = vpop.f32.mrf.mxu2 }
 0x114   : > { %v1951_v56 = vpop.eup %1950  ;;  %v2599_v13 = vpop.f32.mrf.mxu3 }
 0x115   : > { %1042 = vrot.lane.b32.xlu0 %v1951_v56, %s2139_s18  ;;  %v2560_v57 = vpop.f32.mrf.mxu0  ;;  %v1150_v56 = vld [vmem:[%s2916_s3] sm:$0xff] }
 0x116   : > { %1952 = vtanh.f32 %v2560_v57  ;;  %v895_v33 = vadd.f32 %v2636_v31, %v2560_v57  ;;  %v903_v57 = vadd.f32 %v2636_v31, %v2541_v45  ;;  %1190 = vmatpush.msra.mxu1 %v1150_v56  ;;  %v901_v45 = vadd.f32 %v2636_v31, %v2523_v48 }
 0x118   : > { %v943_v51 = vmul.f32 0.01, %v895_v33  ;;  %vm919_vm4 = vcmp.ge.f32.partialorder %v895_v33, 0.0  ;;  %vm927_vm8 = vcmp.ge.f32.partialorder %v903_v57, 0.0  ;;  %vm925_vm11 = vcmp.ge.f32.partialorder %v901_v45, 0.0 }
 0x119   : > { %v949_v30 = vmul.f32 0.01, %v901_v45 }
 0x11b   : > { %v2563_v58 = vpop.f32.mrf.mxu2  ;;  %v973_v56 = vsel %vm925_vm11, %v901_v45, %v949_v30 }
 0x11c   : > { %v1953_v59 = vpop.eup %1952  ;;  %1954 = vtanh.f32 %v2563_v58  ;;  %v2605_v17 = vpop.f32.mrf.mxu3 }
 0x11d   : > { %1044 = vrot.lane.b32.xlu0 %v1953_v59, %s2139_s18  ;;  %v2567_v60 = vpop.f32.mrf.mxu0 }
 0x11e   : > { %1956 = vtanh.f32 %v2567_v60  ;;  %v896_v59 = vadd.f32 %v2636_v31, %v2567_v60 }
 0x11f   : > { %1958 = vtanh.f32 %v2548_v50 }
 0x120   : > { %vm920_vm9 = vcmp.ge.f32.partialorder %v896_v59, 0.0 }
 0x122   : > { %v1955_v61 = vpop.eup %1954 }
 0x123   : > { %v2571_v62 = vpop.f32.mrf.mxu2  ;;  %1066 = vrot.lane.b32.xlu2 %v1955_v61, %s2139_s18  ;;  %v967_v61 = vsel %vm919_vm4, %v895_v33, %v943_v51 }
 0x124   : > { %v1957_v63 = vpop.eup %1956  ;;  %1960 = vtanh.f32 %v2571_v62 }
 0x125   : > { %1046 = vrot.lane.b32.xlu0 %v1957_v63, %s2139_s18  ;;  %v2576_v0 = vpop.f32.mrf.mxu0  ;;  %1962 = vtanh.f32 %v2550_v53  ;;  %v1959_v1 = vpop.eup %1958 }
 0x126   : > { %1964 = vtanh.f32 %v2576_v0  ;;  %v897_v36 = vadd.f32 %v2636_v31, %v2576_v0  ;;  %v906_v0 = vadd.f32 %v2636_v31, %v2563_v58  ;;  %v910_v58 = vadd.f32 %v2636_v31, %v2543_v49 }
 0x128   : > { %vm921_vm1 = vcmp.ge.f32.partialorder %v897_v36, 0.0  ;;  %vm930_vm3 = vcmp.ge.f32.partialorder %v906_v0, 0.0 }
 0x12a   : > { %v1961_v2 = vpop.eup %1960 }
 0x12b   : > { %1068 = vrot.lane.b32.xlu1 %v1961_v2, %s2139_s18  ;;  %1040 = vrot.lane.b32.xlu2 %v1959_v1, %s2139_s18  ;;  %v1963_v3 = vpop.eup %1962  ;;  %v938_v1 = vmul.f32 0.01, %v890_v52 }
 0x12c   : > { %v1965_v5 = vpop.eup %1964 }
 0x12d   : > { %1062 = vrot.lane.b32.xlu0 %v1963_v3, %s2139_s18  ;;  %v2583_v4 = vpop.f32.mrf.mxu0  ;;  %v2667_v3 = vsel %vm915_vm5, %v891_v38, %v939_v47  ;;  %v2676_v43 = vsel %vm914_vm7, %v890_v52, %v938_v1  ;;  %vm934_vm5 = vcmp.ge.f32.partialorder %v910_v58, 0.0 }
 0x12e   : > { %1966 = vtanh.f32 %v2583_v4  ;;  %v898_v40 = vadd.f32 %v2636_v31, %v2583_v4  ;;  %v907_v4 = vadd.f32 %v2636_v31, %v2571_v62  ;;  %v905_v62 = vadd.f32 %v2636_v31, %v2557_v55 }
 0x12f   : > { %1968 = vtanh.f32 %v2586_v6 }
 0x130   : > { %1970 = vtanh.f32 %v2557_v55  ;;  %vm922_vm2 = vcmp.ge.f32.partialorder %v898_v40, 0.0  ;;  %vm931_vm4 = vcmp.ge.f32.partialorder %v907_v4, 0.0 }
 0x134   : > { %v1967_v7 = vpop.eup %1966 }
 0x135   : > { %1048 = vrot.lane.b32.xlu0 %v1965_v5, %s2139_s18  ;;  %1050 = vrot.lane.b32.xlu1 %v1967_v7, %s2139_s18  ;;  %v841_v8 = vpop.f32.mrf.mxu0  ;;  %v1969_v9 = vpop.eup %1968  ;;  %v951_v5 = vmul.f32 0.01, %v903_v57 }
 0x136   : > { %1972 = vtanh.f32 %v841_v8  ;;  %v1971_v10 = vpop.eup %1970  ;;  %v899_v44 = vadd.f32 %v2636_v31, %v841_v8 }
 0x137   : > { %1974 = vtanh.f32 %v2525_v39 }
 0x138   : > { %v947_v63 = vmul.f32 0.01, %v899_v44  ;;  %vm923_vm6 = vcmp.ge.f32.partialorder %v899_v44, 0.0 }
 0x13c   : > { %v1973_v11 = vpop.eup %1972 }
 0x13d   : > { %1064 = vrot.lane.b32.xlu0 %v1971_v10, %s2139_s18  ;;  %1076 = vrot.lane.b32.xlu1 %v1969_v9, %s2139_s18  ;;  %v2595_v12 = vpop.f32.mrf.mxu0  ;;  %v1975_v14 = vpop.eup %1974  ;;  %v944_v10 = vmul.f32 0.01, %v896_v59 }
 0x13e   : > { %1052 = vrot.lane.b32.xlu2 %v1973_v11, %s2139_s18  ;;  %1976 = vtanh.f32 %v2595_v12  ;;  %v900_v9 = vadd.f32 %v2636_v31, %v2595_v12 }
 0x13f   : > { %1978 = vtanh.f32 %v2599_v13  ;;  %v968_v27 = vsel %vm920_vm9, %v896_v59, %v944_v10  ;;  %v954_v10 = vmul.f32 0.01, %v906_v0 }
 0x140   : > { %1980 = vtanh.f32 %v2523_v48  ;;  %v904_v48 = vadd.f32 %v2636_v31, %v2550_v53  ;;  %v948_v26 = vmul.f32 0.01, %v900_v9  ;;  %v893_v53 = vadd.f32 %v2636_v31, %v2548_v50 }
 0x141   : > { %1982 = vtanh.f32 %v2605_v17  ;;  %vm924_vm12 = vcmp.ge.f32.partialorder %v900_v9, 0.0 }
 0x142   : > { %1984 = vtanh.f32 %v2534_v42  ;;  %vm928_vm13 = vcmp.ge.f32.partialorder %v904_v48, 0.0  ;;  %v952_v34 = vmul.f32 0.01, %v904_v48  ;;  %v972_v52 = vsel %vm924_vm12, %v900_v9, %v948_v26 }
 0x143   : > { %vm917_vm0 = vcmp.ge.f32.partialorder %v893_v53, 0.0  ;;  %v911_v9 = vadd.f32 %v2636_v31, %v2586_v6  ;;  %v958_v6 = vmul.f32 0.01, %v910_v58 }
 0x144   : > { %v1977_v15 = vpop.eup %1976 }
 0x145   : > { %1070 = vrot.lane.b32.xlu1 %v1975_v14, %s2139_s18  ;;  %v1979_v16 = vpop.eup %1978  ;;  %v971_v14 = vsel %vm923_vm6, %v899_v44, %v947_v63  ;;  %v950_v44 = vmul.f32 0.01, %v902_v25  ;;  %vm929_vm6 = vcmp.ge.f32.partialorder %v905_v62, 0.0  ;;  %vm935_vm7 = vcmp.ge.f32.partialorder %v911_v9, 0.0 }
 0x146   : > { %1054 = vrot.lane.b32.xlu2 %v1977_v15, %s2139_s18  ;;  %v1981_v18 = vpop.eup %1980 }
 0x147   : > { %v1983_v19 = vpop.eup %1982 }
 0x148   : > { %v1985_v20 = vpop.eup %1984 }
 0x14d   : > { %1078 = vrot.lane.b32.xlu1 %v1979_v16, %s2139_s18 }
 0x14e   : > { %1056 = vrot.lane.b32.xlu2 %v1981_v18, %s2139_s18  ;;  %v894_v18 = vadd.f32 %v2636_v31, %v2554_v54 }
 0x150   : > { %vm918_vm14 = vcmp.ge.f32.partialorder %v894_v18, 0.0 }
 0x155   : > { %1072 = vrot.lane.b32.xlu1 %v1985_v20, %s2139_s18  ;;  %v975_v20 = vsel %vm927_vm8, %v903_v57, %v951_v5  ;;  %v941_v57 = vmul.f32 0.01, %v893_v53  ;;  %v974_v5 = vsel %vm926_vm15, %v902_v25, %v950_v44  ;;  %v953_v25 = vmul.f32 0.01, %v905_v62 }
 0x156   : > { %1080 = vrot.lane.b32.xlu2 %v1983_v19, %s2139_s18  ;;  %v940_v19 = vmul.f32 0.01, %v892_v37  ;;  %vm1162_vm8 = vcmask 523264   ;;  %s1412_s18 = ssub.s32 (%p2226_p5), 10, %s1746_s13 }
 0x157   : > { %v1037_v21 = vpop.permute.xlu2 %1036  ;;  %p1413_p4 = scmp.lt.s32.totalorder (%p2226_p5), %s1412_s18, 4 }
 0x158   : > { %v1107_v7 = vmul.f32 %v1037_v21, %v2667_v3  ;;  %v2692_v33 = vsel %vm916_vm10, %v892_v37, %v940_v19  ;;  %v946_v37 = vmul.f32 0.01, %v898_v40 }
 0x15a   : > { %v970_v55 = vsel %vm922_vm2, %v898_v40, %v946_v37 }
 0x15f   : > { %v2615_v23 = vpop.permute.xlu2 %1038 }
 0x160   : > { %v1108_v38 = vmul.f32 %v2615_v23, %v2692_v33 }
 0x167   : > { %v2613_v22 = vpop.permute.xlu0 %1034 }
 0x175   : > { %v2646_v35 = vpop.permute.xlu1 %1058 }
 0x17d   : > { %v1061_v24 = vpop.permute.xlu0 %1060  ;;  %v2626_v28 = vpop.permute.xlu2 %1066 }
 0x17e   : > { %v2672_v8 = vpop.permute.xlu1 %1074  ;;  %v2682_v21 = vmul.f32 %v1061_v24, %v975_v20  ;;  %v942_v24 = vmul.f32 0.01, %v894_v18 }
 0x180   : > { %v966_v23 = vsel %vm918_vm14, %v894_v18, %v942_v24  ;;  %v959_v24 = vmul.f32 0.01, %v911_v9 }
 0x185   : > { %v2654_v46 = vpop.permute.xlu2 %1040 }
 0x187   : > { %v2628_v29 = vpop.permute.xlu0 %1042 }
 0x188   : > { %v1110_v45 = vmul.f32 %v2628_v29, %v966_v23  ;;  %v1106_v29 = vmul.f32 %v2613_v22, %v2676_v43  ;;  %v1118_v22 = vmul.f32 %v2646_v35, %v974_v5  ;;  %v1223_v35 = vld [vmem:[%s2918_s5 + $0x38] sm:$0xff] }
 0x189   : > { %1248 = vmatpush.msrb.mxu2 %v1223_v35 }
 0x18f   : > { %v1045_v41 = vpop.permute.xlu0 %1044 }
 0x190   : > { %v1111_v2 = vmul.f32 %v1045_v41, %v967_v61  ;;  %v976_v61 = vsel %vm928_vm13, %v904_v48, %v952_v34  ;;  %v1130_v48 = vmax.f32 %v1106_v29, %v1110_v45 }
 0x192   : > { %v1131_v15 = vmax.f32 %v1107_v7, %v1111_v2  ;;  %v945_v2 = vmul.f32 0.01, %v897_v36  ;;  %v2717_v7 = vsel %vm917_vm0, %v893_v53, %v941_v57  ;;  %v978_v53 = vsel %vm930_vm3, %v906_v0, %v954_v10 }
 0x197   : > { %v1047_v60 = vpop.permute.xlu0 %1046 }
 0x198   : > { %v1053_v11 = vpop.permute.xlu2 %1052  ;;  %v1112_v32 = vmul.f32 %v1047_v60, %v968_v27 }
 0x199   : > { %v1115_v16 = vmul.f32 %v1053_v11, %v971_v14  ;;  %v955_v11 = vmul.f32 0.01, %v907_v4  ;;  %v969_v14 = vsel %vm921_vm1, %v897_v36, %v945_v2 }
 0x19a   : > { %v1132_v47 = vmax.f32 %v1108_v38, %v1112_v32  ;;  %v982_v38 = vsel %vm934_vm5, %v910_v58, %v958_v6  ;;  %v1217_v58 = vld [vmem:[%s2918_s5 + $0x8] sm:$0xff] }
 0x19b   : > { %v2684_v12 = vmax.f32 %v1131_v15, %v1115_v16  ;;  %v1109_v16 = vmul.f32 %v2654_v46, %v2717_v7  ;;  %v979_v32 = vsel %vm931_vm4, %v907_v4, %v955_v11  ;;  %v1122_v46 = vmul.f32 %v2626_v28, %v978_v53  ;;  %v1221_v4 = vld [vmem:[%s2918_s5 + $0x28] sm:$0xff]  ;;  %v1289_v53 = vld [vmem:[%s2920_s7 + $0x20] sm:$0xff] }
 0x19c   : > { %v977_v28 = vsel %vm929_vm6, %v905_v62, %v953_v25  ;;  %v1292_v25 = vld [vmem:[%s2920_s7 + $0x38] sm:$0xff] }
 0x19d   : > { %v1139_v54 = vmax.f32 %v2684_v12, %v2682_v21  ;;  %v1069_v50 = vpop.permute.xlu1 %1068  ;;  %v1219_v21 = vld [vmem:[%s2918_s5 + $0x18] sm:$0xff]  ;;  %v1218_v12 = vld [vmem:[%s2918_s5 + $0x10] sm:$0xff]  ;;  %1317 = vmatpush.msrb.mxu3 %v1292_v25 }
 0x19e   : > { %v1123_v34 = vmul.f32 %v1069_v50, %v979_v32 }
 0x19f   : > { %v1063_v41 = vpop.permute.xlu0 %1062 }
 0x1a0   : > { %v1055_v51 = vpop.permute.xlu2 %1054  ;;  %v2706_v63 = vmul.f32 %v1063_v41, %v976_v61  ;;  %v1126_v41 = vmul.f32 %v2672_v8, %v982_v38  ;;  %v1143_v8 = vmax.f32 %v1139_v54, %v1123_v34  ;;  %v1220_v61 = vld [vmem:[%s2918_s5 + $0x20] sm:$0xff]  ;;  %v912_v54 = vadd.f32 %v2636_v31, %v2599_v13  ;;  %v1287_v34 = vld [vmem:[%s2920_s7 + $0x10] sm:$0xff] }
 0x1a1   : > { %v1116_v59 = vmul.f32 %v1055_v51, %v972_v52  ;;  %v1222_v51 = vld [vmem:[%s2918_s5 + $0x30] sm:$0xff]  ;;  %v908_v52 = vadd.f32 %v2636_v31, %v2525_v39  ;;  %v909_v13 = vadd.f32 %v2636_v31, %v2534_v42 }
 0x1a2   : > { %1249 = vmatpush.msrb.mxu2 %v1222_v51  ;;  %vm936_vm10 = vcmp.ge.f32.partialorder %v912_v54, 0.0 }
 0x1a3   : > { %v2708_v1 = vmax.f32 %v1132_v47, %v1116_v59  ;;  %v956_v2 = vmul.f32 0.01, %v908_v52  ;;  %vm932_vm9 = vcmp.ge.f32.partialorder %v908_v52, 0.0  ;;  %vm933_vm11 = vcmp.ge.f32.partialorder %v909_v13, 0.0 }
 0x1a4   : > { %1250 = vmatpush.msrb.mxu2 %v1221_v4  ;;  %v1357_v4 = vld [vmem:[%s2922_s9 + $0x38] sm:$0xff] }
 0x1a5   : > { %v1140_v60 = vmax.f32 %v2708_v1, %v2706_v63  ;;  %v980_v37 = vsel %vm932_vm9, %v908_v52, %v956_v2  ;;  %1378 = vmatpush.msrb.mxu1 %v1357_v4  ;;  %v1355_v2 = vld [vmem:[%s2922_s9 + $0x28] sm:$0xff] }
 0x1a6   : > { %1251 = vmatpush.msrb.mxu2 %v1220_v61 }
 0x1a7   : > { %v1049_v49 = vpop.permute.xlu0 %1048  ;;  %v1051_v15 = vpop.permute.xlu1 %1050 }
 0x1a8   : > { %v1113_v18 = vmul.f32 %v1049_v49, %v969_v14  ;;  %v1114_v19 = vmul.f32 %v1051_v15, %v970_v55  ;;  %v1057_v20 = vpop.permute.xlu2 %1056  ;;  %1252 = vmatpush.msrb.mxu2 %v1219_v21  ;;  %v913_v49 = vadd.f32 %v2636_v31, %v2605_v17  ;;  %v957_v15 = vmul.f32 0.01, %v909_v13  ;;  %v1216_v17 = vld [vmem:[%s2918_s5] sm:$0xff] }
 0x1a9   : > { %v1117_v30 = vmul.f32 %v1057_v20, %v973_v56  ;;  %v983_v56 = vsel %vm935_vm7, %v911_v9, %v959_v24  ;;  %v960_v9 = vmul.f32 0.01, %v912_v54  ;;  %v1933_v31 = vld [vmem:[%s2917_s4] ss:$0 sm:$0xff]  ;;  %v1288_v24 = vld [vmem:[%s2920_s7 + $0x18] sm:$0xff] }
 0x1aa   : > { %v1133_v26 = vmax.f32 %v1109_v16, %v1113_v18  ;;  %v1134_v27 = vmax.f32 %v1130_v48, %v1114_v19  ;;  %1253 = vmatpush.msrb.mxu2 %v1218_v12  ;;  %v961_v63 = vmul.f32 0.01, %v913_v49  ;;  %vm937_vm12 = vcmp.ge.f32.partialorder %v913_v49, 0.0  ;;  %v1354_v12 = vld [vmem:[%s2922_s9 + $0x20] sm:$0xff] }
 0x1ab   : > { %v984_v29 = vsel %vm936_vm10, %v912_v54, %v960_v9  ;;  %vm1399_vm10 = vcmask 130048  }
 0x1ac   : > { %v1138_v36 = vmax.f32 %v1134_v27, %v1118_v22  ;;  %v1137_v40 = vmax.f32 %v1133_v26, %v1117_v30  ;;  %1254 = vmatpush.msrb.mxu2 %v1217_v58  ;;  %v985_v48 = vsel %vm937_vm12, %v913_v49, %v961_v63  ;;  %v1291_v22 = vld [vmem:[%s2920_s7 + $0x30] sm:$0xff]  ;;  %v1290_v27 = vld [vmem:[%s2920_s7 + $0x28] sm:$0xff] }
 0x1ad   : > { %1318 = vmatpush.msrb.mxu3 %v1291_v22 }
 0x1ae   : > { %v1142_v44 = vmax.f32 %v1138_v36, %v1122_v46  ;;  %1255 = vmatpush.msrb.mxu2 %v1216_v17 }
 0x1af   : > { %v1065_v50 = vpop.permute.xlu0 %1064  ;;  %v1077_v57 = vpop.permute.xlu1 %1076  ;;  %1319 = vmatpush.msrb.mxu3 %v1290_v27 }
 0x1b0   : > { %v1121_v47 = vmul.f32 %v1065_v50, %v977_v28  ;;  %v1127_v59 = vmul.f32 %v1077_v57, %v983_v56  ;;  %v1146_v0 = vmax.f32 %v1142_v44, %v1126_v41  ;;  %v1081_v1 = vpop.permute.xlu2 %1080  ;;  %v1286_v56 = vld [vmem:[%s2920_s7 + $0x8] sm:$0xff]  ;;  %v1285_v57 = vld [vmem:[%s2920_s7] sm:$0xff] }
 0x1b1   : > { %v1129_v18 = vmul.f32 %v1081_v1, %v985_v48  ;;  %1320 = vmatpush.msrb.mxu3 %v1289_v53  ;;  %v1350_v1 = vld [vmem:[%s2922_s9] sm:$0xff] }
 0x1b2   : > { %v1141_v39 = vmax.f32 %v1137_v40, %v1121_v47  ;;  %v1147_v23 = vmax.f32 %v1143_v8, %v1127_v59  ;;  %1729 = vmatmul.msk.f32.vlgmr.msra.gmra.mxu1 %vm1162_vm8, %v1146_v0  ;;  %v1934_v8 = vld [vmem:[%s2919_s6] ss:$0 sm:$0xff] }
 0x1b3   : > { %1321 = vmatpush.msrb.mxu3 %v1288_v24 }
 0x1b5   : > { %1322 = vmatpush.msrb.mxu3 %v1287_v34 }
 0x1b7   : > { %v1071_v5 = vpop.permute.xlu1 %1070  ;;  %1323 = vmatpush.msrb.mxu3 %v1286_v56 }
 0x1b8   : > { %v1124_v45 = vmul.f32 %v1071_v5, %v980_v37  ;;  %v1353_v37 = vld [vmem:[%s2922_s9 + $0x18] sm:$0xff]  ;;  %v1352_v5 = vld [vmem:[%s2922_s9 + $0x10] sm:$0xff] }
 0x1b9   : > { %1324 = vmatpush.msrb.mxu3 %v1285_v57 }
 0x1ba   : > { %v1144_v62 = vmax.f32 %v1140_v60, %v1124_v45  ;;  %1730 = vmatmul.msk.f32.gmra.mxu1 %vm1162_vm8, %v1147_v23  ;;  %v981_v60 = vsel %vm933_vm11, %v909_v13, %v957_v15 }
 0x1bf   : > { %v1079_v10 = vpop.permute.xlu1 %1078 }
 0x1c0   : > { %v1128_v11 = vmul.f32 %v1079_v10, %v984_v29 }
 0x1c2   : > { %v1148_v14 = vmax.f32 %v1144_v62, %v1128_v11 }
 0x1c4   : > { %1731 = vmatmul.msk.f32.gmra.mxu1 %vm1162_vm8, %v1148_v14 }
 0x1c7   : > { %v1073_v55 = vpop.permute.xlu1 %1072 }
 0x1c8   : > { %v1125_v16 = vmul.f32 %v1073_v55, %v981_v60 }
 0x1ca   : > { %v1145_v42 = vmax.f32 %v1141_v39, %v1125_v16  ;;  %v1356_v39 = vld [vmem:[%s2922_s9 + $0x30] sm:$0xff] }
 0x1cb   : > { %1379 = vmatpush.msrb.mxu1 %v1356_v39 }
 0x1cc   : > { %v1149_v19 = vmax.f32 %v1145_v42, %v1129_v18 }
 0x1cd   : > { %1380 = vmatpush.msrb.mxu1 %v1355_v2 }
 0x1ce   : > { %1732 = vmatmul.msk.f32.gmra.mxu1 %vm1162_vm8, %v1149_v19 }
 0x1cf   : > { %1381 = vmatpush.msrb.mxu1 %v1354_v12 }
 0x1d1   : > { %1382 = vmatpush.msrb.mxu1 %v1353_v37 }
 0x1d3   : > { %1383 = vmatpush.msrb.mxu1 %v1352_v5 }
 0x22f   : > { %v1192_v20 = vpop.f32.mrf.mxu1 }
 0x230   : > { %v1193_v6 = vadd.f32 %v1933_v31, %v1192_v20 }
 0x232   : > { %vm1204_vm13 = vcmp.ge.f32.partialorder %v1193_v6, 0.0  ;;  %v1208_v26 = vmul.f32 0.01, %v1193_v6 }
 0x234   : > { %v1212_v30 = vsel %vm1204_vm13, %v1193_v6, %v1208_v26 }
 0x235   : > { %1733 = vmatmul.msk.f32.vlgmr.msrb.gmra.mxu2 %vm1162_vm8, %v1212_v30 }
 0x237   : > { %v1195_v32 = vpop.f32.mrf.mxu1 }
 0x238   : > { %v1196_v46 = vadd.f32 %v1933_v31, %v1195_v32 }
 0x23a   : > { %v1209_v36 = vmul.f32 0.01, %v1196_v46  ;;  %vm1205_vm14 = vcmp.ge.f32.partialorder %v1196_v46, 0.0 }
 0x23c   : > { %v1213_v40 = vsel %vm1205_vm14, %v1196_v46, %v1209_v36 }
 0x23d   : > { %1734 = vmatmul.msk.f32.gmra.mxu2 %vm1162_vm8, %v1213_v40 }
 0x241   : > { %v1198_v38 = vpop.f32.mrf.mxu1 }
 0x242   : > { %v1199_v41 = vadd.f32 %v1933_v31, %v1198_v38 }
 0x244   : > { %v1210_v44 = vmul.f32 0.01, %v1199_v41  ;;  %vm1206_vm15 = vcmp.ge.f32.partialorder %v1199_v41, 0.0 }
 0x246   : > { %v1214_v35 = vsel %vm1206_vm15, %v1199_v41, %v1210_v44 }
 0x247   : > { %1735 = vmatmul.msk.f32.gmra.mxu2 %vm1162_vm8, %v1214_v35 }
 0x24b   : > { %v1201_v51 = vpop.f32.mrf.mxu1 }
 0x24c   : > { %v1202_v52 = vadd.f32 %v1933_v31, %v1201_v51 }
 0x24e   : > { %v1211_v28 = vmul.f32 0.01, %v1202_v52  ;;  %vm1207_vm0 = vcmp.ge.f32.partialorder %v1202_v52, 0.0 }
 0x250   : > { %v1215_v50 = vsel %vm1207_vm0, %v1202_v52, %v1211_v28 }
 0x251   : > { %1736 = vmatmul.msk.f32.gmra.mxu2 %vm1162_vm8, %v1215_v50 }
 0x2b8   : > { %v1257_v47 = vpop.f32.mrf.mxu2 }
 0x2b9   : > { %v1258_v59 = vadd.f32 %v1934_v8, %v1257_v47 }
 0x2bb   : > { %vm1269_vm1 = vcmp.ge.f32.partialorder %v1258_v59, 0.0  ;;  %v1273_v0 = vmul.f32 0.01, %v1258_v59 }
 0x2bd   : > { %v1277_v23 = vsel %vm1269_vm1, %v1258_v59, %v1273_v0 }
 0x2be   : > { %v1281_v61 = vadd.f32 %v1277_v23, %v2676_v43 }
 0x2c0   : > { %v1260_v21 = vpop.f32.mrf.mxu2  ;;  %1737 = vmatmul.msk.f32.vlgmr.msrb.gmra.mxu3 %vm1162_vm8, %v1281_v61 }
 0x2c1   : > { %v1261_v54 = vadd.f32 %v1934_v8, %v1260_v21 }
 0x2c3   : > { %vm1270_vm2 = vcmp.ge.f32.partialorder %v1261_v54, 0.0  ;;  %v1274_v43 = vmul.f32 0.01, %v1261_v54 }
 0x2c5   : > { %v1278_v45 = vsel %vm1270_vm2, %v1261_v54, %v1274_v43 }
 0x2c6   : > { %v1282_v58 = vadd.f32 %v1278_v45, %v2667_v3  ;;  %v1351_v3 = vld [vmem:[%s2922_s9 + $0x8] sm:$0xff] }
 0x2c7   : > { %1384 = vmatpush.msrb.mxu1 %v1351_v3 }
 0x2c8   : > { %1738 = vmatmul.msk.f32.gmra.mxu3 %vm1162_vm8, %v1282_v58 }
 0x2c9   : > { %1385 = vmatpush.msrb.mxu1 %v1350_v1 }
 0x2ca   : > { %v1263_v62 = vpop.f32.mrf.mxu2 }
 0x2cb   : > { %v1264_v9 = vadd.f32 %v1934_v8, %v1263_v62 }
 0x2cd   : > { %vm1271_vm3 = vcmp.ge.f32.partialorder %v1264_v9, 0.0  ;;  %v1275_v13 = vmul.f32 0.01, %v1264_v9 }
 0x2cf   : > { %v1279_v29 = vsel %vm1271_vm3, %v1264_v9, %v1275_v13 }
 0x2d0   : > { %v1283_v10 = vadd.f32 %v1279_v29, %v2692_v33  ;;  %v1935_v33 = vld [vmem:[%s2921_s8] ss:$0 sm:$0xff] }
 0x2d2   : > { %1739 = vmatmul.msk.f32.gmra.mxu3 %vm1162_vm8, %v1283_v10 }
 0x2d4   : > { %v1266_v11 = vpop.f32.mrf.mxu2 }
 0x2d5   : > { %v1267_v49 = vadd.f32 %v1934_v8, %v1266_v11 }
 0x2d7   : > { %vm1272_vm4 = vcmp.ge.f32.partialorder %v1267_v49, 0.0  ;;  %v1276_v14 = vmul.f32 0.01, %v1267_v49 }
 0x2d9   : > { %v1280_v15 = vsel %vm1272_vm4, %v1267_v49, %v1276_v14 }
 0x2da   : > { %v1284_v63 = vadd.f32 %v1280_v15, %v2717_v7 }
 0x2dc   : > { %1740 = vmatmul.msk.f32.gmra.mxu3 %vm1162_vm8, %v1284_v63 }
 0x343   : > { %v1326_v60 = vpop.f32.mrf.mxu3 }
 0x344   : > { %v1327_v55 = vadd.f32 %v1935_v33, %v1326_v60 }
 0x346   : > { %vm1338_vm5 = vcmp.ge.f32.partialorder %v1327_v55, 0.0  ;;  %v1342_v7 = vmul.f32 0.01, %v1327_v55 }
 0x348   : > { %v1346_v16 = vsel %vm1338_vm5, %v1327_v55, %v1342_v7 }
 0x349   : > { %1741 = vmatmul.msk.f32.vlgmr.msrb.gmra.mxu1 %vm1162_vm8, %v1346_v16 }
 0x34b   : > { %v1329_v48 = vpop.f32.mrf.mxu3 }
 0x34c   : > { %v1330_v18 = vadd.f32 %v1935_v33, %v1329_v48 }
 0x34e   : > { %v1343_v42 = vmul.f32 0.01, %v1330_v18  ;;  %vm1339_vm6 = vcmp.ge.f32.partialorder %v1330_v18, 0.0 }
 0x350   : > { %v1347_v19 = vsel %vm1339_vm6, %v1330_v18, %v1343_v42 }
 0x351   : > { %1742 = vmatmul.msk.f32.gmra.mxu1 %vm1162_vm8, %v1347_v19 }
 0x355   : > { %v1332_v17 = vpop.f32.mrf.mxu3 }
 0x356   : > { %v1333_v31 = vadd.f32 %v1935_v33, %v1332_v17 }
 0x358   : > { %v1344_v20 = vmul.f32 0.01, %v1333_v31  ;;  %vm1340_vm7 = vcmp.ge.f32.partialorder %v1333_v31, 0.0 }
 0x35a   : > { %v1348_v6 = vsel %vm1340_vm7, %v1333_v31, %v1344_v20 }
 0x35b   : > { %1743 = vmatmul.msk.f32.gmra.mxu1 %vm1162_vm8, %v1348_v6 }
 0x35f   : > { %v1335_v25 = vpop.f32.mrf.mxu3 }
 0x360   : > { %v1336_v22 = vadd.f32 %v1935_v33, %v1335_v25 }
 0x362   : > { %v1345_v26 = vmul.f32 0.01, %v1336_v22  ;;  %vm1341_vm9 = vcmp.ge.f32.partialorder %v1336_v22, 0.0 }
 0x364   : > { %v1349_v27 = vsel %vm1341_vm9, %v1336_v22, %v1345_v26 }
 0x365   : > { %1744 = vmatmul.msk.f32.gmra.mxu1 %vm1162_vm8, %v1349_v27 }
 0x3c6   : > { %v1387_v30 = vpop.f32.mrf.mxu1 }
 0x3c7   : > { %1400 = vst.msk [vmem:[%s2851_s23] sm:$0xff] %vm1399_vm10, %v1387_v30 }
 0x3ce   : > { %v1390_v53 = vpop.f32.mrf.mxu1 }
 0x3cf   : > { %1401 = vst.msk [vmem:[%s2851_s23 + $0x8] sm:$0xff] %vm1399_vm10, %v1390_v53 }
 0x3d8   : > { %v1393_v32 = vpop.f32.mrf.mxu1 }
 0x3d9   : > { %1402 = vst.msk [vmem:[%s2851_s23 + $0x10] sm:$0xff] %vm1399_vm10, %v1393_v32 }
 0x3df   : > { %1410 = sbr.rel (!%p2226_p5) target bundleno = 1035 (0x40b), region = 116 }
 0x3e2   : > { %v1396_v24 = vpop.f32.mrf.mxu1 }
 0x3e3   : > { %1403 = vst.msk [vmem:[%s2851_s23 + $0x18] sm:$0xff] %vm1399_vm10, %v1396_v24 }
 0x3e4   : > { %s2950_s18 = smov (!%p1413_p4, %s1412_s18), 4 }
 0x3e5   : > { %s1747_s29 = sshll.u32 %s2950_s18, 3 }
 0x3e6   : > { %p1750_p6 = scmp.eq.s32.totalorder %s1747_s29, 0 }
 0x3e7   : > { %s2870_s21 = sshrl.u32 (!%p1750_p6), %s2950_s18, 2 }
 0x3e8   : > { %1421 = sbr.rel (%p1750_p6) target bundleno = 1035 (0x40b), region = 120  ;;  %p1751_p5 = scmp.le.s32.totalorder (!%p1750_p6), %s2870_s21, 0 }
 0x3ed   : > { %1642 = sbr.rel (%p1751_p5) target bundleno = 1018 (0x3fa), region = 231  ;;  %s2936_s16 = smov (!%p1751_p5), %s2864_s25 }
 0x3ee   : > { %s2937_s11 = smov (!%p1751_p5), %s2851_s23  ;;  %s2879_s12 = smov (!%p1751_p5), 0  }
 0x3ef   : > { %s2118_s24 = smov (!%p1751_p5), 0  }
 0x3f2 LB: >> { %v1490_v46 = vld [vmem:[%s2112_s11] sm:$0xff]  ;;  %v1492_v34 = vld [vmem:[%s2112_s11 + $0x8] sm:$0xff]  ;;  %v1494_v36 = vld [vmem:[%s2112_s11 + $0x10] sm:$0xff]  ;;  %s1498_s27 = sadd.s32 1, %s2116_s12  ;;  %s1484_s24 = sadd.s32 1, %s2120_s24   ;;  %s2120_s24 = sphi %s2118_s24, %s1484_s24   ;;  %s2116_s12 = sphi %s2879_s12, %s2938_s12   ;;  %s2112_s11 = sphi %s2937_s11, %s1503_s11   ;;  %s2108_s16 = sphi %s2936_s16, %s1504_s16  }
 0x3f3   : >> { %1491 = vst [vmem:[%s2108_s16] sm:$0xff] %v1490_v46  ;;  %v1496_v40 = vld [vmem:[%s2112_s11 + $0x18] sm:$0xff]  ;;  %p1499_p7 = scmp.ge.s32.totalorder %s1498_s27, %s2870_s21  ;;  %p1483_p8 = scmp.ge.s32.totalorder %s1484_s24, %s2870_s21 }
 0x3f4   : >> { %1493 = vst [vmem:[%s2108_s16 + $0x8] sm:$0xff] %v1492_v34 }
 0x3f5   : >> { %1495 = vst [vmem:[%s2108_s16 + $0x10] sm:$0xff] %v1494_v36  ;;  %s2952_s27 = smov (%p1499_p7, %s1498_s27), 0  ;;  %1486 = sbr.rel (!%p1483_p8) target bundleno = 1010 (0x3f2), region = 237 }
 0x3f6   : >> { %1497 = vst [vmem:[%s2108_s16 + $0x18] sm:$0xff] %v1496_v40  ;;  %s1752_s0 = sshll.u32 %s2952_s27, 5  ;;  %s2938_s12 = smov %s2952_s27 }
 0x3f7   : >> { %s1503_s11 = scalar_lea.vmem %s2851_s23, %s1752_s0 [#allocation3]   ;;  %s1504_s16 = scalar_lea.vmem %s2864_s25, %s1752_s0  }
 0x3fa PF: > { %s2895_s20 = sand.u32 3, %s2950_s18   ;;  %s1766_s15 = sshll.u32 %s2870_s21, 5 }
 0x3fb   : > { %s1509_s28 = scalar_lea.vmem %s2851_s23, %s1766_s15 [#allocation3]   ;;  %s1511_s26 = scalar_lea.vmem %s2864_s25, %s1766_s15  }
 0x3fc   : > { %p1757_p9 = scmp.le.s32.totalorder %s2895_s20, 0 }
 0x3fd   : > { %s2122_s13 = smov (!%p1757_p9), %s1511_s26   ;;  %s2126_s30 = smov (!%p1757_p9), %s1509_s28  }
 0x3fe   : > { %1656 = sbr.rel (%p1757_p9) target bundleno = 1035 (0x40b), region = 242  ;;  %s2130_s19 = smov (!%p1757_p9), 0  }
 0x3ff   : > { %s2134_s22 = smov (!%p1757_p9), 0  }
 0x403 LB: >> { %v1521_v38 = vld [vmem:[%s2128_s30] sm:$0xff]  ;;  %s1523_s18 = sadd.s32 1, %s2132_s19  ;;  %s1515_s22 = sadd.s32 1, %s2136_s22   ;;  %s2136_s22 = sphi %s2134_s22, %s1515_s22   ;;  %s2132_s19 = sphi %s2130_s19, %s2131_s19   ;;  %s2128_s30 = sphi %s2126_s30, %s1528_s30   ;;  %s2124_s13 = sphi %s2122_s13, %s1529_s13  }
 0x404   : >> { %1522 = vst [vmem:[%s2124_s13] sm:$0xff] %v1521_v38  ;;  %p1524_p10 = scmp.ge.s32.totalorder %s1523_s18, %s2895_s20  ;;  %p1514_p11 = scmp.ge.s32.totalorder %s1515_s22, %s2895_s20 }
 0x406   : >> { %s2954_s18 = smov (%p1524_p10, %s1523_s18), 0  ;;  %1517 = sbr.rel (!%p1514_p11) target bundleno = 1027 (0x403), region = 248 }
 0x407   : >> { %s1758_s23 = sshll.u32 %s2954_s18, 3  ;;  %s2131_s19 = smov %s2954_s18  }
 0x408   : >> { %s1528_s30 = scalar_lea.vmem %s1509_s28, %s1758_s23 [#allocation3]   ;;  %s1529_s13 = scalar_lea.vmem %s1511_s26, %s1758_s23  }
 0x40b PF: > { %s2939_s25 = sld [smem:[#allocation4_spill]]  ;;  %p17_p12 = scmp.ge.s32.totalorder %s2214_s17, 5  }
 0x40c   : > { %s2940_s13 = smov %s2068_s14  ;;  %s2942_s15 = smov %s2214_s17 }
 0x40d   :  { %19 = sbr.rel (!%p17_p12) target bundleno = 4 (0x4), region = 259 }
 0x411   : > { %s2941_s14 = smov %s2939_s25 }

</bundles_post_ra>
